<compile_context>
chip_gen: v7x
topology: tpu7x:2x2x1
jax: 0.10.0
libtpu: 0.0.40
codegen_flags: <defaults>
</compile_context>

<pallas_src>
import math
import functools

import jax
import jax.numpy as jnp
from jax import lax
from jax.experimental import pallas as pl
from jax.experimental.pallas import tpu as pltpu


# ----------------------------------------------------------------------------
# Fully fused decoder kernel (all LSTM layers + fcx + fcy in one pallas_call)
# ----------------------------------------------------------------------------
def _make_decoder_kernel(num_layers, T, B, E, H, A, XO, YO):
    def kernel(*refs):
        # ---- unpack refs: inputs, outputs, scratch ---------------------------
        cur = 0
        x_ref = refs[cur]; cur += 1            # (T, B, E)  time-major
        a_ref = refs[cur]; cur += 1            # (T, B, A)  time-major
        lstm_refs = refs[cur:cur + 3 * num_layers]; cur += 3 * num_layers
        wx_ref, bx_ref, wyh_ref, wya_ref, by_ref = refs[cur:cur + 5]; cur += 5
        xout_ref, yout_ref = refs[cur:cur + 2]; cur += 2
        p_scr, h_scr = refs[cur:cur + 2]       # (T, B, 4H) and (T, B, H) VMEM

        def run_layer(seq2d, wih_ref, whh_ref, b_ref):
            # Hoisted input projection + bias for ALL timesteps: one big matmul.
            p = (
                jnp.dot(seq2d, wih_ref[...], preferred_element_type=jnp.float32)
                + b_ref[...]
            )
            p_scr[...] = p.reshape(T, B, 4 * H)

            whh = whh_ref[...]                 # (H, 4H), resident in vregs/VMEM

            def step(t, carry):
                h, c = carry
                # Only the recurrent part stays in the serial loop.
                gates = p_scr[t] + jnp.dot(
                    h, whh, preferred_element_type=jnp.float32
                )
                # TODO(synk): with H=32 the gate slices are sub-128-lane (XLU
                #             extracts); lane-aligned only when H % 128 == 0.
                i = jax.nn.sigmoid(gates[:, 0 * H:1 * H])
                f = jax.nn.sigmoid(gates[:, 1 * H:2 * H])
                g = jnp.tanh(gates[:, 2 * H:3 * H])
                o = jax.nn.sigmoid(gates[:, 3 * H:4 * H])
                c_new = f * c + i * g
                h_new = o * jnp.tanh(c_new)
                h_scr[t] = h_new               # accumulate sequence in VMEM
                return (h_new, c_new)

            zeros = jnp.zeros((B, H), jnp.float32)
            lax.fori_loop(0, T, step, (zeros, zeros), unroll=(T <= 16))

        # ---- layer 0 (input dim E), then layers 1..L-1 (input dim H) --------
        run_layer(x_ref[...].reshape(T * B, E),
                  lstm_refs[0], lstm_refs[1], lstm_refs[2])
        for l in range(1, num_layers):
            run_layer(h_scr[...].reshape(T * B, H),
                      lstm_refs[3 * l], lstm_refs[3 * l + 1], lstm_refs[3 * l + 2])

        # ---- fused heads: fcx and fcy (concat eliminated via W_y split) ------
        out2d = h_scr[...].reshape(T * B, H)
        x_out = (
            jnp.dot(out2d, wx_ref[...], preferred_element_type=jnp.float32)
            + bx_ref[...]
        )
        xout_ref[...] = x_out.reshape(T, B, XO).astype(xout_ref.dtype)

        a2d = a_ref[...].reshape(T * B, A)
        y_out = (
            jnp.dot(out2d, wyh_ref[...], preferred_element_type=jnp.float32)
            + jnp.dot(a2d, wya_ref[...], preferred_element_type=jnp.float32)
            + by_ref[...]
        )
        yout_ref[...] = y_out.reshape(T, B, YO).astype(yout_ref.dtype)

    return kernel


def _full_spec(shape):
    nd = len(shape)
    return pl.BlockSpec(tuple(shape), lambda *_, n=nd: (0,) * n)


# ----------------------------------------------------------------------------
# Decoder forward (single fused Pallas kernel; only transposes stay in XLA)
# ----------------------------------------------------------------------------
@jax.jit
def decoder_forward(x, a, params):
    B, T, E = x.shape
    A = a.shape[-1]
    lstm = params["lstm"]
    num_layers = len(lstm)
    H = lstm[0][1].shape[0]
    XO = params["wx_t"].shape[1]
    YO = params["wy_t"].shape[1]

    # time-major inside the kernel: contiguous per-timestep (B, feature) slabs
    xt = jnp.transpose(x, (1, 0, 2))           # (T, B, E)
    at = jnp.transpose(a, (1, 0, 2))           # (T, B, A)

    lstm_flat = []
    for (wih_t, whh_t, bias) in lstm:
        lstm_flat += [wih_t, whh_t, bias]

    wy_t = params["wy_t"]                      # (H + A, YO)
    wy_h = wy_t[:H]                            # multiplies LSTM output
    wy_a = wy_t[H:]                            # multiplies a  (no concat needed)

    inputs = [xt, at] + lstm_flat + [
        params["wx_t"], params["bx"], wy_h, wy_a, params["by"]
    ]

    kernel = _make_decoder_kernel(num_layers, T, B, E, H, A, XO, YO)

    x_out_tm, y_out_tm = pl.pallas_call(
        kernel,
        out_shape=(
            jax.ShapeDtypeStruct((T, B, XO), jnp.float32),
            jax.ShapeDtypeStruct((T, B, YO), jnp.float32),
        ),
        in_specs=[_full_spec(arr.shape) for arr in inputs],
        out_specs=(_full_spec((T, B, XO)), _full_spec((T, B, YO))),
        scratch_shapes=[
            pltpu.VMEM((T, B, 4 * H), jnp.float32),   # hoisted input projection
            pltpu.VMEM((T, B, H), jnp.float32),       # per-layer output sequence
        ],
    )(*inputs)

    x_out = jnp.transpose(x_out_tm, (1, 0, 2))        # (B, T, XO)
    y_out = jnp.transpose(y_out_tm, (1, 0, 2))        # (B, T, YO)
    return x_out, y_out


# ----------------------------------------------------------------------------
# Pure-JAX reference (for correctness check) and parameter init
# ----------------------------------------------------------------------------
@jax.jit
def decoder_reference(x, a, params):
    B, T, _ = x.shape
    h_seq = x
    for (wih_t, whh_t, bias) in params["lstm"]:
        H = whh_t.shape[0]

        def step(carry, x_t):
            h, c = carry
            gates = x_t @ wih_t + h @ whh_t + bias[0]
            i, f, g, o = jnp.split(gates, 4, axis=-1)
            c = jax.nn.sigmoid(f) * c + jax.nn.sigmoid(i) * jnp.tanh(g)
            h = jax.nn.sigmoid(o) * jnp.tanh(c)
            return (h, c), h

        init = (jnp.zeros((B, H), jnp.float32), jnp.zeros((B, H), jnp.float32))
        _, hs = lax.scan(step, init, jnp.transpose(h_seq, (1, 0, 2)))
        h_seq = jnp.transpose(hs, (1, 0, 2))
    out = h_seq
    x_out = out @ params["wx_t"] + params["bx"]
    y_out = jnp.concatenate([out, a], axis=-1) @ params["wy_t"] + params["by"]
    return x_out, y_out


def init_decoder_params(key, embed_size, hidden_size2, x_size, a_size, y_size,
                        num_layers):
    """Deterministic init matching PyTorch shapes (uniform +-1/sqrt(fan))."""
    params = {"lstm": []}
    k_lstm = 1.0 / math.sqrt(hidden_size2)
    in_sz = embed_size
    for _ in range(num_layers):
        key, k1, k2, k3, k4 = jax.random.split(key, 5)
        w_ih = jax.random.uniform(k1, (4 * hidden_size2, in_sz), jnp.float32,
                                  -k_lstm, k_lstm)
        w_hh = jax.random.uniform(k2, (4 * hidden_size2, hidden_size2), jnp.float32,
                                  -k_lstm, k_lstm)
        b_ih = jax.random.uniform(k3, (4 * hidden_size2,), jnp.float32, -k_lstm, k_lstm)
        b_hh = jax.random.uniform(k4, (4 * hidden_size2,), jnp.float32, -k_lstm, k_lstm)
        params["lstm"].append(
            (w_ih.T, w_hh.T, (b_ih + b_hh).reshape(1, 4 * hidden_size2))
        )
        in_sz = hidden_size2

    key, k1, k2, k3, k4 = jax.random.split(key, 5)
    kx = 1.0 / math.sqrt(hidden_size2)
    params["wx_t"] = jax.random.uniform(k1, (x_size, hidden_size2), jnp.float32,
                                        -kx, kx).T
    params["bx"] = jax.random.uniform(k2, (x_size,), jnp.float32, -kx, kx).reshape(1, -1)
    ky = 1.0 / math.sqrt(hidden_size2 + a_size)
    params["wy_t"] = jax.random.uniform(k3, (y_size, hidden_size2 + a_size),
                                        jnp.float32, -ky, ky).T
    params["by"] = jax.random.uniform(k4, (y_size,), jnp.float32, -ky, ky).reshape(1, -1)
    return params


if __name__ == "__main__":
    # Small deterministic example consistent with the module's forward:
    #   x: (batch, seq, embed_size), a: (batch, seq, a_size)
    batch, seq = 8, 8
    embed_size, hidden_size2 = 16, 32
    x_size, a_size, y_size = 16, 8, 12
    num_layers = 2

    key = jax.random.PRNGKey(0)
    key, kx, ka, kp = jax.random.split(key, 4)
    x = jax.random.normal(kx, (batch, seq, embed_size), jnp.float32)
    a = jax.random.normal(ka, (batch, seq, a_size), jnp.float32)

    params = init_decoder_params(kp, embed_size, hidden_size2, x_size, a_size,
                                 y_size, num_layers)

    x_out, y_out = decoder_forward(x, a, params)
    jax.block_until_ready((x_out, y_out))

    assert x_out.shape == (batch, seq, x_size), x_out.shape
    assert y_out.shape == (batch, seq, y_size), y_out.shape

    # Correctness check against a pure-JAX reference of the same module.
    x_ref, y_ref = decoder_reference(x, a, params)
    jax.block_until_ready((x_ref, y_ref))
    assert jnp.allclose(x_out, x_ref, atol=1e-3, rtol=1e-3), "fcx output mismatch"
    assert jnp.allclose(y_out, y_ref, atol=1e-3, rtol=1e-3), "fcy output mismatch"

    print("KERNEL_OK")
</pallas_src>

<mosaic_0001>
module attributes {stable_mosaic.version = 11 : i64} {
  func.func @kernel(%arg0: memref<8x8x16xf32, #tpu.memory_space<vmem>>, %arg1: memref<8x8x8xf32, #tpu.memory_space<vmem>>, %arg2: memref<16x128xf32, #tpu.memory_space<vmem>>, %arg3: memref<32x128xf32, #tpu.memory_space<vmem>>, %arg4: memref<1x128xf32, #tpu.memory_space<vmem>>, %arg5: memref<32x128xf32, #tpu.memory_space<vmem>>, %arg6: memref<32x128xf32, #tpu.memory_space<vmem>>, %arg7: memref<1x128xf32, #tpu.memory_space<vmem>>, %arg8: memref<32x16xf32, #tpu.memory_space<vmem>>, %arg9: memref<1x16xf32, #tpu.memory_space<vmem>>, %arg10: memref<32x12xf32, #tpu.memory_space<vmem>>, %arg11: memref<8x12xf32, #tpu.memory_space<vmem>>, %arg12: memref<1x12xf32, #tpu.memory_space<vmem>>, %arg13: memref<8x8x16xf32, #tpu.memory_space<vmem>>, %arg14: memref<8x8x12xf32, #tpu.memory_space<vmem>>, %arg15: memref<8x8x128xf32, #tpu.memory_space<vmem>>, %arg16: memref<8x8x32xf32, #tpu.memory_space<vmem>>) attributes {dimension_semantics = [], scalar_prefetch = 0 : i64, scratch_operands = 2 : i64, tpu.core_type = #tpu.core_type<tc>} {
    %c0 = arith.constant 0 : index
    %c0_0 = arith.constant 0 : index
    %c0_1 = arith.constant 0 : index
    %0 = vector.load %arg0[%c0, %c0_0, %c0_1] : memref<8x8x16xf32, #tpu.memory_space<vmem>>, vector<8x8x16xf32>
    %1 = vector.shape_cast %0 : vector<8x8x16xf32> to vector<64x16xf32>
    %c0_2 = arith.constant 0 : index
    %c0_3 = arith.constant 0 : index
    %2 = vector.load %arg2[%c0_2, %c0_3] : memref<16x128xf32, #tpu.memory_space<vmem>>, vector<16x128xf32>
    %cst = arith.constant dense<0.000000e+00> : vector<64x128xf32>
    %3 = tpu.matmul %1, %2, %cst {dimension_numbers = #tpu.dot_dimension_numbers<[1], [0], [0], [1], [0, 0, 1, 1], [], []>} : vector<64x16xf32>, vector<16x128xf32>, vector<64x128xf32> -> vector<64x128xf32>
    %c0_4 = arith.constant 0 : index
    %c0_5 = arith.constant 0 : index
    %4 = vector.load %arg4[%c0_4, %c0_5] : memref<1x128xf32, #tpu.memory_space<vmem>>, vector<1x128xf32>
    %5 = vector.broadcast %4 : vector<1x128xf32> to vector<64x128xf32>
    %6 = arith.addf %3, %5 : vector<64x128xf32>
    %7 = vector.shape_cast %6 : vector<64x128xf32> to vector<8x8x128xf32>
    %c0_6 = arith.constant 0 : index
    %c0_7 = arith.constant 0 : index
    %c0_8 = arith.constant 0 : index
    %8 = vector.load %arg15[%c0_6, %c0_7, %c0_8] : memref<8x8x128xf32, #tpu.memory_space<vmem>>, vector<8x8x128xf32>
    tpu.vector_store %arg15[%c0_6, %c0_7, %c0_8], %7 {strides = array<i32>} : memref<8x8x128xf32, #tpu.memory_space<vmem>>, vector<8x8x128xf32>,
    %c0_9 = arith.constant 0 : index
    %c0_10 = arith.constant 0 : index
    %9 = vector.load %arg3[%c0_9, %c0_10] : memref<32x128xf32, #tpu.memory_space<vmem>>, vector<32x128xf32>
    %cst_11 = arith.constant 0.000000e+00 : f32
    %10 = vector.broadcast %cst_11 : f32 to vector<8x32xf32>
    %c0_i32 = arith.constant 0 : i32
    %11 = arith.index_cast %c0_i32 : i32 to index
    %c0_12 = arith.constant 0 : index
    %c0_13 = arith.constant 0 : index
    %12 = vector.load %arg15[%11, %c0_12, %c0_13] : memref<8x8x128xf32, #tpu.memory_space<vmem>>, vector<1x8x128xf32>
    %13 = vector.shape_cast %12 : vector<1x8x128xf32> to vector<8x128xf32>
    %cst_14 = arith.constant dense<0.000000e+00> : vector<8x128xf32>
    %14 = tpu.matmul %10, %9, %cst_14 {dimension_numbers = #tpu.dot_dimension_numbers<[1], [0], [0], [1], [0, 0, 1, 1], [], []>} : vector<8x32xf32>, vector<32x128xf32>, vector<8x128xf32> -> vector<8x128xf32>
    %15 = arith.addf %13, %14 : vector<8x128xf32>
    %16 = vector.extract_strided_slice %15 {offsets = [0, 0], sizes = [8, 32], strides = [1, 1]} : vector<8x128xf32> to vector<8x32xf32>
    %17 = arith.negf %16 : vector<8x32xf32>
    %18 = math.exp %17 : vector<8x32xf32>
    %cst_15 = arith.constant 1.000000e+00 : f32
    %19 = vector.broadcast %cst_15 : f32 to vector<8x32xf32>
    %20 = arith.addf %19, %18 : vector<8x32xf32>
    %21 = arith.divf %19, %20 : vector<8x32xf32>
    %22 = vector.extract_strided_slice %15 {offsets = [0, 32], sizes = [8, 32], strides = [1, 1]} : vector<8x128xf32> to vector<8x32xf32>
    %23 = arith.negf %22 : vector<8x32xf32>
    %24 = math.exp %23 : vector<8x32xf32>
    %cst_16 = arith.constant 1.000000e+00 : f32
    %25 = vector.broadcast %cst_16 : f32 to vector<8x32xf32>
    %26 = arith.addf %25, %24 : vector<8x32xf32>
    %27 = arith.divf %25, %26 : vector<8x32xf32>
    %28 = vector.extract_strided_slice %15 {offsets = [0, 64], sizes = [8, 32], strides = [1, 1]} : vector<8x128xf32> to vector<8x32xf32>
    %29 = math.tanh %28 : vector<8x32xf32>
    %30 = vector.extract_strided_slice %15 {offsets = [0, 96], sizes = [8, 32], strides = [1, 1]} : vector<8x128xf32> to vector<8x32xf32>
    %31 = arith.negf %30 : vector<8x32xf32>
    %32 = math.exp %31 : vector<8x32xf32>
    %cst_17 = arith.constant 1.000000e+00 : f32
    %33 = vector.broadcast %cst_17 : f32 to vector<8x32xf32>
    %34 = arith.addf %33, %32 : vector<8x32xf32>
    %35 = arith.divf %33, %34 : vector<8x32xf32>
    %36 = arith.mulf %27, %10 : vector<8x32xf32>
    %37 = arith.mulf %21, %29 : vector<8x32xf32>
    %38 = arith.addf %36, %37 : vector<8x32xf32>
    %39 = math.tanh %38 : vector<8x32xf32>
    %40 = arith.mulf %35, %39 : vector<8x32xf32>
    %41 = arith.index_cast %c0_i32 : i32 to index
    %c0_18 = arith.constant 0 : index
    %c0_19 = arith.constant 0 : index
    %42 = vector.load %arg16[%41, %c0_18, %c0_19] : memref<8x8x32xf32, #tpu.memory_space<vmem>>, vector<1x8x32xf32>
    %43 = vector.shape_cast %42 : vector<1x8x32xf32> to vector<8x32xf32>
    %44 = vector.shape_cast %40 : vector<8x32xf32> to vector<1x8x32xf32>
    tpu.vector_store %arg16[%41, %c0_18, %c0_19], %44 {strides = array<i32>} : memref<8x8x32xf32, #tpu.memory_space<vmem>>, vector<1x8x32xf32>,
    %c1_i32 = arith.constant 1 : i32
    %45 = arith.index_cast %c1_i32 : i32 to index
    %c0_20 = arith.constant 0 : index
    %c0_21 = arith.constant 0 : index
    %46 = vector.load %arg15[%45, %c0_20, %c0_21] : memref<8x8x128xf32, #tpu.memory_space<vmem>>, vector<1x8x128xf32>
    %47 = vector.shape_cast %46 : vector<1x8x128xf32> to vector<8x128xf32>
    %cst_22 = arith.constant dense<0.000000e+00> : vector<8x128xf32>
    %48 = tpu.matmul %40, %9, %cst_22 {dimension_numbers = #tpu.dot_dimension_numbers<[1], [0], [0], [1], [0, 0, 1, 1], [], []>} : vector<8x32xf32>, vector<32x128xf32>, vector<8x128xf32> -> vector<8x128xf32>
    %49 = arith.addf %47, %48 : vector<8x128xf32>
    %50 = vector.extract_strided_slice %49 {offsets = [0, 0], sizes = [8, 32], strides = [1, 1]} : vector<8x128xf32> to vector<8x32xf32>
    %51 = arith.negf %50 : vector<8x32xf32>
    %52 = math.exp %51 : vector<8x32xf32>
    %cst_23 = arith.constant 1.000000e+00 : f32
    %53 = vector.broadcast %cst_23 : f32 to vector<8x32xf32>
    %54 = arith.addf %53, %52 : vector<8x32xf32>
    %55 = arith.divf %53, %54 : vector<8x32xf32>
    %56 = vector.extract_strided_slice %49 {offsets = [0, 32], sizes = [8, 32], strides = [1, 1]} : vector<8x128xf32> to vector<8x32xf32>
    %57 = arith.negf %56 : vector<8x32xf32>
    %58 = math.exp %57 : vector<8x32xf32>
    %cst_24 = arith.constant 1.000000e+00 : f32
    %59 = vector.broadcast %cst_24 : f32 to vector<8x32xf32>
    %60 = arith.addf %59, %58 : vector<8x32xf32>
    %61 = arith.divf %59, %60 : vector<8x32xf32>
    %62 = vector.extract_strided_slice %49 {offsets = [0, 64], sizes = [8, 32], strides = [1, 1]} : vector<8x128xf32> to vector<8x32xf32>
    %63 = math.tanh %62 : vector<8x32xf32>
    %64 = vector.extract_strided_slice %49 {offsets = [0, 96], sizes = [8, 32], strides = [1, 1]} : vector<8x128xf32> to vector<8x32xf32>
    %65 = arith.negf %64 : vector<8x32xf32>
    %66 = math.exp %65 : vector<8x32xf32>
    %cst_25 = arith.constant 1.000000e+00 : f32
    %67 = vector.broadcast %cst_25 : f32 to vector<8x32xf32>
    %68 = arith.addf %67, %66 : vector<8x32xf32>
    %69 = arith.divf %67, %68 : vector<8x32xf32>
    %70 = arith.mulf %61, %38 : vector<8x32xf32>
    %71 = arith.mulf %55, %63 : vector<8x32xf32>
    %72 = arith.addf %70, %71 : vector<8x32xf32>
    %73 = math.tanh %72 : vector<8x32xf32>
    %74 = arith.mulf %69, %73 : vector<8x32xf32>
    %75 = arith.index_cast %c1_i32 : i32 to index
    %c0_26 = arith.constant 0 : index
    %c0_27 = arith.constant 0 : index
    %76 = vector.load %arg16[%75, %c0_26, %c0_27] : memref<8x8x32xf32, #tpu.memory_space<vmem>>, vector<1x8x32xf32>
    %77 = vector.shape_cast %76 : vector<1x8x32xf32> to vector<8x32xf32>
    %78 = vector.shape_cast %74 : vector<8x32xf32> to vector<1x8x32xf32>
    tpu.vector_store %arg16[%75, %c0_26, %c0_27], %78 {strides = array<i32>} : memref<8x8x32xf32, #tpu.memory_space<vmem>>, vector<1x8x32xf32>,
    %c2_i32 = arith.constant 2 : i32
    %79 = arith.index_cast %c2_i32 : i32 to index
    %c0_28 = arith.constant 0 : index
    %c0_29 = arith.constant 0 : index
    %80 = vector.load %arg15[%79, %c0_28, %c0_29] : memref<8x8x128xf32, #tpu.memory_space<vmem>>, vector<1x8x128xf32>
    %81 = vector.shape_cast %80 : vector<1x8x128xf32> to vector<8x128xf32>
    %cst_30 = arith.constant dense<0.000000e+00> : vector<8x128xf32>
    %82 = tpu.matmul %74, %9, %cst_30 {dimension_numbers = #tpu.dot_dimension_numbers<[1], [0], [0], [1], [0, 0, 1, 1], [], []>} : vector<8x32xf32>, vector<32x128xf32>, vector<8x128xf32> -> vector<8x128xf32>
    %83 = arith.addf %81, %82 : vector<8x128xf32>
    %84 = vector.extract_strided_slice %83 {offsets = [0, 0], sizes = [8, 32], strides = [1, 1]} : vector<8x128xf32> to vector<8x32xf32>
    %85 = arith.negf %84 : vector<8x32xf32>
    %86 = math.exp %85 : vector<8x32xf32>
    %cst_31 = arith.constant 1.000000e+00 : f32
    %87 = vector.broadcast %cst_31 : f32 to vector<8x32xf32>
    %88 = arith.addf %87, %86 : vector<8x32xf32>
    %89 = arith.divf %87, %88 : vector<8x32xf32>
    %90 = vector.extract_strided_slice %83 {offsets = [0, 32], sizes = [8, 32], strides = [1, 1]} : vector<8x128xf32> to vector<8x32xf32>
    %91 = arith.negf %90 : vector<8x32xf32>
    %92 = math.exp %91 : vector<8x32xf32>
    %cst_32 = arith.constant 1.000000e+00 : f32
    %93 = vector.broadcast %cst_32 : f32 to vector<8x32xf32>
    %94 = arith.addf %93, %92 : vector<8x32xf32>
    %95 = arith.divf %93, %94 : vector<8x32xf32>
    %96 = vector.extract_strided_slice %83 {offsets = [0, 64], sizes = [8, 32], strides = [1, 1]} : vector<8x128xf32> to vector<8x32xf32>
    %97 = math.tanh %96 : vector<8x32xf32>
    %98 = vector.extract_strided_slice %83 {offsets = [0, 96], sizes = [8, 32], strides = [1, 1]} : vector<8x128xf32> to vector<8x32xf32>
    %99 = arith.negf %98 : vector<8x32xf32>
    %100 = math.exp %99 : vector<8x32xf32>
    %cst_33 = arith.constant 1.000000e+00 : f32
    %101 = vector.broadcast %cst_33 : f32 to vector<8x32xf32>
    %102 = arith.addf %101, %100 : vector<8x32xf32>
    %103 = arith.divf %101, %102 : vector<8x32xf32>
    %104 = arith.mulf %95, %72 : vector<8x32xf32>
    %105 = arith.mulf %89, %97 : vector<8x32xf32>
    %106 = arith.addf %104, %105 : vector<8x32xf32>
    %107 = math.tanh %106 : vector<8x32xf32>
    %108 = arith.mulf %103, %107 : vector<8x32xf32>
    %109 = arith.index_cast %c2_i32 : i32 to index
    %c0_34 = arith.constant 0 : index
    %c0_35 = arith.constant 0 : index
    %110 = vector.load %arg16[%109, %c0_34, %c0_35] : memref<8x8x32xf32, #tpu.memory_space<vmem>>, vector<1x8x32xf32>
    %111 = vector.shape_cast %110 : vector<1x8x32xf32> to vector<8x32xf32>
    %112 = vector.shape_cast %108 : vector<8x32xf32> to vector<1x8x32xf32>
    tpu.vector_store %arg16[%109, %c0_34, %c0_35], %112 {strides = array<i32>} : memref<8x8x32xf32, #tpu.memory_space<vmem>>, vector<1x8x32xf32>,
    %c3_i32 = arith.constant 3 : i32
    %113 = arith.index_cast %c3_i32 : i32 to index
    %c0_36 = arith.constant 0 : index
    %c0_37 = arith.constant 0 : index
    %114 = vector.load %arg15[%113, %c0_36, %c0_37] : memref<8x8x128xf32, #tpu.memory_space<vmem>>, vector<1x8x128xf32>
    %115 = vector.shape_cast %114 : vector<1x8x128xf32> to vector<8x128xf32>
    %cst_38 = arith.constant dense<0.000000e+00> : vector<8x128xf32>
    %116 = tpu.matmul %108, %9, %cst_38 {dimension_numbers = #tpu.dot_dimension_numbers<[1], [0], [0], [1], [0, 0, 1, 1], [], []>} : vector<8x32xf32>, vector<32x128xf32>, vector<8x128xf32> -> vector<8x128xf32>
    %117 = arith.addf %115, %116 : vector<8x128xf32>
    %118 = vector.extract_strided_slice %117 {offsets = [0, 0], sizes = [8, 32], strides = [1, 1]} : vector<8x128xf32> to vector<8x32xf32>
    %119 = arith.negf %118 : vector<8x32xf32>
    %120 = math.exp %119 : vector<8x32xf32>
    %cst_39 = arith.constant 1.000000e+00 : f32
    %121 = vector.broadcast %cst_39 : f32 to vector<8x32xf32>
    %122 = arith.addf %121, %120 : vector<8x32xf32>
    %123 = arith.divf %121, %122 : vector<8x32xf32>
    %124 = vector.extract_strided_slice %117 {offsets = [0, 32], sizes = [8, 32], strides = [1, 1]} : vector<8x128xf32> to vector<8x32xf32>
    %125 = arith.negf %124 : vector<8x32xf32>
    %126 = math.exp %125 : vector<8x32xf32>
    %cst_40 = arith.constant 1.000000e+00 : f32
    %127 = vector.broadcast %cst_40 : f32 to vector<8x32xf32>
    %128 = arith.addf %127, %126 : vector<8x32xf32>
    %129 = arith.divf %127, %128 : vector<8x32xf32>
    %130 = vector.extract_strided_slice %117 {offsets = [0, 64], sizes = [8, 32], strides = [1, 1]} : vector<8x128xf32> to vector<8x32xf32>
    %131 = math.tanh %130 : vector<8x32xf32>
    %132 = vector.extract_strided_slice %117 {offsets = [0, 96], sizes = [8, 32], strides = [1, 1]} : vector<8x128xf32> to vector<8x32xf32>
    %133 = arith.negf %132 : vector<8x32xf32>
    %134 = math.exp %133 : vector<8x32xf32>
    %cst_41 = arith.constant 1.000000e+00 : f32
    %135 = vector.broadcast %cst_41 : f32 to vector<8x32xf32>
    %136 = arith.addf %135, %134 : vector<8x32xf32>
    %137 = arith.divf %135, %136 : vector<8x32xf32>
    %138 = arith.mulf %129, %106 : vector<8x32xf32>
    %139 = arith.mulf %123, %131 : vector<8x32xf32>
    %140 = arith.addf %138, %139 : vector<8x32xf32>
    %141 = math.tanh %140 : vector<8x32xf32>
    %142 = arith.mulf %137, %141 : vector<8x32xf32>
    %143 = arith.index_cast %c3_i32 : i32 to index
    %c0_42 = arith.constant 0 : index
    %c0_43 = arith.constant 0 : index
    %144 = vector.load %arg16[%143, %c0_42, %c0_43] : memref<8x8x32xf32, #tpu.memory_space<vmem>>, vector<1x8x32xf32>
    %145 = vector.shape_cast %144 : vector<1x8x32xf32> to vector<8x32xf32>
    %146 = vector.shape_cast %142 : vector<8x32xf32> to vector<1x8x32xf32>
    tpu.vector_store %arg16[%143, %c0_42, %c0_43], %146 {strides = array<i32>} : memref<8x8x32xf32, #tpu.memory_space<vmem>>, vector<1x8x32xf32>,
    %c4_i32 = arith.constant 4 : i32
    %147 = arith.index_cast %c4_i32 : i32 to index
    %c0_44 = arith.constant 0 : index
    %c0_45 = arith.constant 0 : index
    %148 = vector.load %arg15[%147, %c0_44, %c0_45] : memref<8x8x128xf32, #tpu.memory_space<vmem>>, vector<1x8x128xf32>
    %149 = vector.shape_cast %148 : vector<1x8x128xf32> to vector<8x128xf32>
    %cst_46 = arith.constant dense<0.000000e+00> : vector<8x128xf32>
    %150 = tpu.matmul %142, %9, %cst_46 {dimension_numbers = #tpu.dot_dimension_numbers<[1], [0], [0], [1], [0, 0, 1, 1], [], []>} : vector<8x32xf32>, vector<32x128xf32>, vector<8x128xf32> -> vector<8x128xf32>
    %151 = arith.addf %149, %150 : vector<8x128xf32>
    %152 = vector.extract_strided_slice %151 {offsets = [0, 0], sizes = [8, 32], strides = [1, 1]} : vector<8x128xf32> to vector<8x32xf32>
    %153 = arith.negf %152 : vector<8x32xf32>
    %154 = math.exp %153 : vector<8x32xf32>
    %cst_47 = arith.constant 1.000000e+00 : f32
    %155 = vector.broadcast %cst_47 : f32 to vector<8x32xf32>
    %156 = arith.addf %155, %154 : vector<8x32xf32>
    %157 = arith.divf %155, %156 : vector<8x32xf32>
    %158 = vector.extract_strided_slice %151 {offsets = [0, 32], sizes = [8, 32], strides = [1, 1]} : vector<8x128xf32> to vector<8x32xf32>
    %159 = arith.negf %158 : vector<8x32xf32>
    %160 = math.exp %159 : vector<8x32xf32>
    %cst_48 = arith.constant 1.000000e+00 : f32
    %161 = vector.broadcast %cst_48 : f32 to vector<8x32xf32>
    %162 = arith.addf %161, %160 : vector<8x32xf32>
    %163 = arith.divf %161, %162 : vector<8x32xf32>
    %164 = vector.extract_strided_slice %151 {offsets = [0, 64], sizes = [8, 32], strides = [1, 1]} : vector<8x128xf32> to vector<8x32xf32>
    %165 = math.tanh %164 : vector<8x32xf32>
    %166 = vector.extract_strided_slice %151 {offsets = [0, 96], sizes = [8, 32], strides = [1, 1]} : vector<8x128xf32> to vector<8x32xf32>
    %167 = arith.negf %166 : vector<8x32xf32>
    %168 = math.exp %167 : vector<8x32xf32>
    %cst_49 = arith.constant 1.000000e+00 : f32
    %169 = vector.broadcast %cst_49 : f32 to vector<8x32xf32>
    %170 = arith.addf %169, %168 : vector<8x32xf32>
    %171 = arith.divf %169, %170 : vector<8x32xf32>
    %172 = arith.mulf %163, %140 : vector<8x32xf32>
    %173 = arith.mulf %157, %165 : vector<8x32xf32>
    %174 = arith.addf %172, %173 : vector<8x32xf32>
    %175 = math.tanh %174 : vector<8x32xf32>
    %176 = arith.mulf %171, %175 : vector<8x32xf32>
    %177 = arith.index_cast %c4_i32 : i32 to index
    %c0_50 = arith.constant 0 : index
    %c0_51 = arith.constant 0 : index
    %178 = vector.load %arg16[%177, %c0_50, %c0_51] : memref<8x8x32xf32, #tpu.memory_space<vmem>>, vector<1x8x32xf32>
    %179 = vector.shape_cast %178 : vector<1x8x32xf32> to vector<8x32xf32>
    %180 = vector.shape_cast %176 : vector<8x32xf32> to vector<1x8x32xf32>
    tpu.vector_store %arg16[%177, %c0_50, %c0_51], %180 {strides = array<i32>} : memref<8x8x32xf32, #tpu.memory_space<vmem>>, vector<1x8x32xf32>,
    %c5_i32 = arith.constant 5 : i32
    %181 = arith.index_cast %c5_i32 : i32 to index
    %c0_52 = arith.constant 0 : index
    %c0_53 = arith.constant 0 : index
    %182 = vector.load %arg15[%181, %c0_52, %c0_53] : memref<8x8x128xf32, #tpu.memory_space<vmem>>, vector<1x8x128xf32>
    %183 = vector.shape_cast %182 : vector<1x8x128xf32> to vector<8x128xf32>
    %cst_54 = arith.constant dense<0.000000e+00> : vector<8x128xf32>
    %184 = tpu.matmul %176, %9, %cst_54 {dimension_numbers = #tpu.dot_dimension_numbers<[1], [0], [0], [1], [0, 0, 1, 1], [], []>} : vector<8x32xf32>, vector<32x128xf32>, vector<8x128xf32> -> vector<8x128xf32>
    %185 = arith.addf %183, %184 : vector<8x128xf32>
    %186 = vector.extract_strided_slice %185 {offsets = [0, 0], sizes = [8, 32], strides = [1, 1]} : vector<8x128xf32> to vector<8x32xf32>
    %187 = arith.negf %186 : vector<8x32xf32>
    %188 = math.exp %187 : vector<8x32xf32>
    %cst_55 = arith.constant 1.000000e+00 : f32
    %189 = vector.broadcast %cst_55 : f32 to vector<8x32xf32>
    %190 = arith.addf %189, %188 : vector<8x32xf32>
    %191 = arith.divf %189, %190 : vector<8x32xf32>
    %192 = vector.extract_strided_slice %185 {offsets = [0, 32], sizes = [8, 32], strides = [1, 1]} : vector<8x128xf32> to vector<8x32xf32>
    %193 = arith.negf %192 : vector<8x32xf32>
    %194 = math.exp %193 : vector<8x32xf32>
    %cst_56 = arith.constant 1.000000e+00 : f32
    %195 = vector.broadcast %cst_56 : f32 to vector<8x32xf32>
    %196 = arith.addf %195, %194 : vector<8x32xf32>
    %197 = arith.divf %195, %196 : vector<8x32xf32>
    %198 = vector.extract_strided_slice %185 {offsets = [0, 64], sizes = [8, 32], strides = [1, 1]} : vector<8x128xf32> to vector<8x32xf32>
    %199 = math.tanh %198 : vector<8x32xf32>
    %200 = vector.extract_strided_slice %185 {offsets = [0, 96], sizes = [8, 32], strides = [1, 1]} : vector<8x128xf32> to vector<8x32xf32>
    %201 = arith.negf %200 : vector<8x32xf32>
    %202 = math.exp %201 : vector<8x32xf32>
    %cst_57 = arith.constant 1.000000e+00 : f32
    %203 = vector.broadcast %cst_57 : f32 to vector<8x32xf32>
    %204 = arith.addf %203, %202 : vector<8x32xf32>
    %205 = arith.divf %203, %204 : vector<8x32xf32>
    %206 = arith.mulf %197, %174 : vector<8x32xf32>
    %207 = arith.mulf %191, %199 : vector<8x32xf32>
    %208 = arith.addf %206, %207 : vector<8x32xf32>
    %209 = math.tanh %208 : vector<8x32xf32>
    %210 = arith.mulf %205, %209 : vector<8x32xf32>
    %211 = arith.index_cast %c5_i32 : i32 to index
    %c0_58 = arith.constant 0 : index
    %c0_59 = arith.constant 0 : index
    %212 = vector.load %arg16[%211, %c0_58, %c0_59] : memref<8x8x32xf32, #tpu.memory_space<vmem>>, vector<1x8x32xf32>
    %213 = vector.shape_cast %212 : vector<1x8x32xf32> to vector<8x32xf32>
    %214 = vector.shape_cast %210 : vector<8x32xf32> to vector<1x8x32xf32>
    tpu.vector_store %arg16[%211, %c0_58, %c0_59], %214 {strides = array<i32>} : memref<8x8x32xf32, #tpu.memory_space<vmem>>, vector<1x8x32xf32>,
    %c6_i32 = arith.constant 6 : i32
    %215 = arith.index_cast %c6_i32 : i32 to index
    %c0_60 = arith.constant 0 : index
    %c0_61 = arith.constant 0 : index
    %216 = vector.load %arg15[%215, %c0_60, %c0_61] : memref<8x8x128xf32, #tpu.memory_space<vmem>>, vector<1x8x128xf32>
    %217 = vector.shape_cast %216 : vector<1x8x128xf32> to vector<8x128xf32>
    %cst_62 = arith.constant dense<0.000000e+00> : vector<8x128xf32>
    %218 = tpu.matmul %210, %9, %cst_62 {dimension_numbers = #tpu.dot_dimension_numbers<[1], [0], [0], [1], [0, 0, 1, 1], [], []>} : vector<8x32xf32>, vector<32x128xf32>, vector<8x128xf32> -> vector<8x128xf32>
    %219 = arith.addf %217, %218 : vector<8x128xf32>
    %220 = vector.extract_strided_slice %219 {offsets = [0, 0], sizes = [8, 32], strides = [1, 1]} : vector<8x128xf32> to vector<8x32xf32>
    %221 = arith.negf %220 : vector<8x32xf32>
    %222 = math.exp %221 : vector<8x32xf32>
    %cst_63 = arith.constant 1.000000e+00 : f32
    %223 = vector.broadcast %cst_63 : f32 to vector<8x32xf32>
    %224 = arith.addf %223, %222 : vector<8x32xf32>
    %225 = arith.divf %223, %224 : vector<8x32xf32>
    %226 = vector.extract_strided_slice %219 {offsets = [0, 32], sizes = [8, 32], strides = [1, 1]} : vector<8x128xf32> to vector<8x32xf32>
    %227 = arith.negf %226 : vector<8x32xf32>
    %228 = math.exp %227 : vector<8x32xf32>
    %cst_64 = arith.constant 1.000000e+00 : f32
    %229 = vector.broadcast %cst_64 : f32 to vector<8x32xf32>
    %230 = arith.addf %229, %228 : vector<8x32xf32>
    %231 = arith.divf %229, %230 : vector<8x32xf32>
    %232 = vector.extract_strided_slice %219 {offsets = [0, 64], sizes = [8, 32], strides = [1, 1]} : vector<8x128xf32> to vector<8x32xf32>
    %233 = math.tanh %232 : vector<8x32xf32>
    %234 = vector.extract_strided_slice %219 {offsets = [0, 96], sizes = [8, 32], strides = [1, 1]} : vector<8x128xf32> to vector<8x32xf32>
    %235 = arith.negf %234 : vector<8x32xf32>
    %236 = math.exp %235 : vector<8x32xf32>
    %cst_65 = arith.constant 1.000000e+00 : f32
    %237 = vector.broadcast %cst_65 : f32 to vector<8x32xf32>
    %238 = arith.addf %237, %236 : vector<8x32xf32>
    %239 = arith.divf %237, %238 : vector<8x32xf32>
    %240 = arith.mulf %231, %208 : vector<8x32xf32>
    %241 = arith.mulf %225, %233 : vector<8x32xf32>
    %242 = arith.addf %240, %241 : vector<8x32xf32>
    %243 = math.tanh %242 : vector<8x32xf32>
    %244 = arith.mulf %239, %243 : vector<8x32xf32>
    %245 = arith.index_cast %c6_i32 : i32 to index
    %c0_66 = arith.constant 0 : index
    %c0_67 = arith.constant 0 : index
    %246 = vector.load %arg16[%245, %c0_66, %c0_67] : memref<8x8x32xf32, #tpu.memory_space<vmem>>, vector<1x8x32xf32>
    %247 = vector.shape_cast %246 : vector<1x8x32xf32> to vector<8x32xf32>
    %248 = vector.shape_cast %244 : vector<8x32xf32> to vector<1x8x32xf32>
    tpu.vector_store %arg16[%245, %c0_66, %c0_67], %248 {strides = array<i32>} : memref<8x8x32xf32, #tpu.memory_space<vmem>>, vector<1x8x32xf32>,
    %c7_i32 = arith.constant 7 : i32
    %249 = arith.index_cast %c7_i32 : i32 to index
    %c0_68 = arith.constant 0 : index
    %c0_69 = arith.constant 0 : index
    %250 = vector.load %arg15[%249, %c0_68, %c0_69] : memref<8x8x128xf32, #tpu.memory_space<vmem>>, vector<1x8x128xf32>
    %251 = vector.shape_cast %250 : vector<1x8x128xf32> to vector<8x128xf32>
    %cst_70 = arith.constant dense<0.000000e+00> : vector<8x128xf32>
    %252 = tpu.matmul %244, %9, %cst_70 {dimension_numbers = #tpu.dot_dimension_numbers<[1], [0], [0], [1], [0, 0, 1, 1], [], []>} : vector<8x32xf32>, vector<32x128xf32>, vector<8x128xf32> -> vector<8x128xf32>
    %253 = arith.addf %251, %252 : vector<8x128xf32>
    %254 = vector.extract_strided_slice %253 {offsets = [0, 0], sizes = [8, 32], strides = [1, 1]} : vector<8x128xf32> to vector<8x32xf32>
    %255 = arith.negf %254 : vector<8x32xf32>
    %256 = math.exp %255 : vector<8x32xf32>
    %cst_71 = arith.constant 1.000000e+00 : f32
    %257 = vector.broadcast %cst_71 : f32 to vector<8x32xf32>
    %258 = arith.addf %257, %256 : vector<8x32xf32>
    %259 = arith.divf %257, %258 : vector<8x32xf32>
    %260 = vector.extract_strided_slice %253 {offsets = [0, 32], sizes = [8, 32], strides = [1, 1]} : vector<8x128xf32> to vector<8x32xf32>
    %261 = arith.negf %260 : vector<8x32xf32>
    %262 = math.exp %261 : vector<8x32xf32>
    %cst_72 = arith.constant 1.000000e+00 : f32
    %263 = vector.broadcast %cst_72 : f32 to vector<8x32xf32>
    %264 = arith.addf %263, %262 : vector<8x32xf32>
    %265 = arith.divf %263, %264 : vector<8x32xf32>
    %266 = vector.extract_strided_slice %253 {offsets = [0, 64], sizes = [8, 32], strides = [1, 1]} : vector<8x128xf32> to vector<8x32xf32>
    %267 = math.tanh %266 : vector<8x32xf32>
    %268 = vector.extract_strided_slice %253 {offsets = [0, 96], sizes = [8, 32], strides = [1, 1]} : vector<8x128xf32> to vector<8x32xf32>
    %269 = arith.negf %268 : vector<8x32xf32>
    %270 = math.exp %269 : vector<8x32xf32>
    %cst_73 = arith.constant 1.000000e+00 : f32
    %271 = vector.broadcast %cst_73 : f32 to vector<8x32xf32>
    %272 = arith.addf %271, %270 : vector<8x32xf32>
    %273 = arith.divf %271, %272 : vector<8x32xf32>
    %274 = arith.mulf %265, %242 : vector<8x32xf32>
    %275 = arith.mulf %259, %267 : vector<8x32xf32>
    %276 = arith.addf %274, %275 : vector<8x32xf32>
    %277 = math.tanh %276 : vector<8x32xf32>
    %278 = arith.mulf %273, %277 : vector<8x32xf32>
    %279 = arith.index_cast %c7_i32 : i32 to index
    %c0_74 = arith.constant 0 : index
    %c0_75 = arith.constant 0 : index
    %280 = vector.load %arg16[%279, %c0_74, %c0_75] : memref<8x8x32xf32, #tpu.memory_space<vmem>>, vector<1x8x32xf32>
    %281 = vector.shape_cast %280 : vector<1x8x32xf32> to vector<8x32xf32>
    %282 = vector.shape_cast %278 : vector<8x32xf32> to vector<1x8x32xf32>
    tpu.vector_store %arg16[%279, %c0_74, %c0_75], %282 {strides = array<i32>} : memref<8x8x32xf32, #tpu.memory_space<vmem>>, vector<1x8x32xf32>,
    %c8_i32 = arith.constant 8 : i32
    %c0_76 = arith.constant 0 : index
    %c0_77 = arith.constant 0 : index
    %c0_78 = arith.constant 0 : index
    %283 = vector.load %arg16[%c0_76, %c0_77, %c0_78] : memref<8x8x32xf32, #tpu.memory_space<vmem>>, vector<8x8x32xf32>
    %284 = vector.shape_cast %283 : vector<8x8x32xf32> to vector<64x32xf32>
    %c0_79 = arith.constant 0 : index
    %c0_80 = arith.constant 0 : index
    %285 = vector.load %arg5[%c0_79, %c0_80] : memref<32x128xf32, #tpu.memory_space<vmem>>, vector<32x128xf32>
    %cst_81 = arith.constant dense<0.000000e+00> : vector<64x128xf32>
    %286 = tpu.matmul %284, %285, %cst_81 {dimension_numbers = #tpu.dot_dimension_numbers<[1], [0], [0], [1], [0, 0, 1, 1], [], []>} : vector<64x32xf32>, vector<32x128xf32>, vector<64x128xf32> -> vector<64x128xf32>
    %c0_82 = arith.constant 0 : index
    %c0_83 = arith.constant 0 : index
    %287 = vector.load %arg7[%c0_82, %c0_83] : memref<1x128xf32, #tpu.memory_space<vmem>>, vector<1x128xf32>
    %288 = vector.broadcast %287 : vector<1x128xf32> to vector<64x128xf32>
    %289 = arith.addf %286, %288 : vector<64x128xf32>
    %290 = vector.shape_cast %289 : vector<64x128xf32> to vector<8x8x128xf32>
    %c0_84 = arith.constant 0 : index
    %c0_85 = arith.constant 0 : index
    %c0_86 = arith.constant 0 : index
    %291 = vector.load %arg15[%c0_84, %c0_85, %c0_86] : memref<8x8x128xf32, #tpu.memory_space<vmem>>, vector<8x8x128xf32>
    tpu.vector_store %arg15[%c0_84, %c0_85, %c0_86], %290 {strides = array<i32>} : memref<8x8x128xf32, #tpu.memory_space<vmem>>, vector<8x8x128xf32>,
    %c0_87 = arith.constant 0 : index
    %c0_88 = arith.constant 0 : index
    %292 = vector.load %arg6[%c0_87, %c0_88] : memref<32x128xf32, #tpu.memory_space<vmem>>, vector<32x128xf32>
    %cst_89 = arith.constant 0.000000e+00 : f32
    %293 = vector.broadcast %cst_89 : f32 to vector<8x32xf32>
    %c0_i32_90 = arith.constant 0 : i32
    %294 = arith.index_cast %c0_i32_90 : i32 to index
    %c0_91 = arith.constant 0 : index
    %c0_92 = arith.constant 0 : index
    %295 = vector.load %arg15[%294, %c0_91, %c0_92] : memref<8x8x128xf32, #tpu.memory_space<vmem>>, vector<1x8x128xf32>
    %296 = vector.shape_cast %295 : vector<1x8x128xf32> to vector<8x128xf32>
    %cst_93 = arith.constant dense<0.000000e+00> : vector<8x128xf32>
    %297 = tpu.matmul %293, %292, %cst_93 {dimension_numbers = #tpu.dot_dimension_numbers<[1], [0], [0], [1], [0, 0, 1, 1], [], []>} : vector<8x32xf32>, vector<32x128xf32>, vector<8x128xf32> -> vector<8x128xf32>
    %298 = arith.addf %296, %297 : vector<8x128xf32>
    %299 = vector.extract_strided_slice %298 {offsets = [0, 0], sizes = [8, 32], strides = [1, 1]} : vector<8x128xf32> to vector<8x32xf32>
    %300 = arith.negf %299 : vector<8x32xf32>
    %301 = math.exp %300 : vector<8x32xf32>
    %cst_94 = arith.constant 1.000000e+00 : f32
    %302 = vector.broadcast %cst_94 : f32 to vector<8x32xf32>
    %303 = arith.addf %302, %301 : vector<8x32xf32>
    %304 = arith.divf %302, %303 : vector<8x32xf32>
    %305 = vector.extract_strided_slice %298 {offsets = [0, 32], sizes = [8, 32], strides = [1, 1]} : vector<8x128xf32> to vector<8x32xf32>
    %306 = arith.negf %305 : vector<8x32xf32>
    %307 = math.exp %306 : vector<8x32xf32>
    %cst_95 = arith.constant 1.000000e+00 : f32
    %308 = vector.broadcast %cst_95 : f32 to vector<8x32xf32>
    %309 = arith.addf %308, %307 : vector<8x32xf32>
    %310 = arith.divf %308, %309 : vector<8x32xf32>
    %311 = vector.extract_strided_slice %298 {offsets = [0, 64], sizes = [8, 32], strides = [1, 1]} : vector<8x128xf32> to vector<8x32xf32>
    %312 = math.tanh %311 : vector<8x32xf32>
    %313 = vector.extract_strided_slice %298 {offsets = [0, 96], sizes = [8, 32], strides = [1, 1]} : vector<8x128xf32> to vector<8x32xf32>
    %314 = arith.negf %313 : vector<8x32xf32>
    %315 = math.exp %314 : vector<8x32xf32>
    %cst_96 = arith.constant 1.000000e+00 : f32
    %316 = vector.broadcast %cst_96 : f32 to vector<8x32xf32>
    %317 = arith.addf %316, %315 : vector<8x32xf32>
    %318 = arith.divf %316, %317 : vector<8x32xf32>
    %319 = arith.mulf %310, %293 : vector<8x32xf32>
    %320 = arith.mulf %304, %312 : vector<8x32xf32>
    %321 = arith.addf %319, %320 : vector<8x32xf32>
    %322 = math.tanh %321 : vector<8x32xf32>
    %323 = arith.mulf %318, %322 : vector<8x32xf32>
    %324 = arith.index_cast %c0_i32_90 : i32 to index
    %c0_97 = arith.constant 0 : index
    %c0_98 = arith.constant 0 : index
    %325 = vector.load %arg16[%324, %c0_97, %c0_98] : memref<8x8x32xf32, #tpu.memory_space<vmem>>, vector<1x8x32xf32>
    %326 = vector.shape_cast %325 : vector<1x8x32xf32> to vector<8x32xf32>
    %327 = vector.shape_cast %323 : vector<8x32xf32> to vector<1x8x32xf32>
    tpu.vector_store %arg16[%324, %c0_97, %c0_98], %327 {strides = array<i32>} : memref<8x8x32xf32, #tpu.memory_space<vmem>>, vector<1x8x32xf32>,
    %c1_i32_99 = arith.constant 1 : i32
    %328 = arith.index_cast %c1_i32_99 : i32 to index
    %c0_100 = arith.constant 0 : index
    %c0_101 = arith.constant 0 : index
    %329 = vector.load %arg15[%328, %c0_100, %c0_101] : memref<8x8x128xf32, #tpu.memory_space<vmem>>, vector<1x8x128xf32>
    %330 = vector.shape_cast %329 : vector<1x8x128xf32> to vector<8x128xf32>
    %cst_102 = arith.constant dense<0.000000e+00> : vector<8x128xf32>
    %331 = tpu.matmul %323, %292, %cst_102 {dimension_numbers = #tpu.dot_dimension_numbers<[1], [0], [0], [1], [0, 0, 1, 1], [], []>} : vector<8x32xf32>, vector<32x128xf32>, vector<8x128xf32> -> vector<8x128xf32>
    %332 = arith.addf %330, %331 : vector<8x128xf32>
    %333 = vector.extract_strided_slice %332 {offsets = [0, 0], sizes = [8, 32], strides = [1, 1]} : vector<8x128xf32> to vector<8x32xf32>
    %334 = arith.negf %333 : vector<8x32xf32>
    %335 = math.exp %334 : vector<8x32xf32>
    %cst_103 = arith.constant 1.000000e+00 : f32
    %336 = vector.broadcast %cst_103 : f32 to vector<8x32xf32>
    %337 = arith.addf %336, %335 : vector<8x32xf32>
    %338 = arith.divf %336, %337 : vector<8x32xf32>
    %339 = vector.extract_strided_slice %332 {offsets = [0, 32], sizes = [8, 32], strides = [1, 1]} : vector<8x128xf32> to vector<8x32xf32>
    %340 = arith.negf %339 : vector<8x32xf32>
    %341 = math.exp %340 : vector<8x32xf32>
    %cst_104 = arith.constant 1.000000e+00 : f32
    %342 = vector.broadcast %cst_104 : f32 to vector<8x32xf32>
    %343 = arith.addf %342, %341 : vector<8x32xf32>
    %344 = arith.divf %342, %343 : vector<8x32xf32>
    %345 = vector.extract_strided_slice %332 {offsets = [0, 64], sizes = [8, 32], strides = [1, 1]} : vector<8x128xf32> to vector<8x32xf32>
    %346 = math.tanh %345 : vector<8x32xf32>
    %347 = vector.extract_strided_slice %332 {offsets = [0, 96], sizes = [8, 32], strides = [1, 1]} : vector<8x128xf32> to vector<8x32xf32>
    %348 = arith.negf %347 : vector<8x32xf32>
    %349 = math.exp %348 : vector<8x32xf32>
    %cst_105 = arith.constant 1.000000e+00 : f32
    %350 = vector.broadcast %cst_105 : f32 to vector<8x32xf32>
    %351 = arith.addf %350, %349 : vector<8x32xf32>
    %352 = arith.divf %350, %351 : vector<8x32xf32>
    %353 = arith.mulf %344, %321 : vector<8x32xf32>
    %354 = arith.mulf %338, %346 : vector<8x32xf32>
    %355 = arith.addf %353, %354 : vector<8x32xf32>
    %356 = math.tanh %355 : vector<8x32xf32>
    %357 = arith.mulf %352, %356 : vector<8x32xf32>
    %358 = arith.index_cast %c1_i32_99 : i32 to index
    %c0_106 = arith.constant 0 : index
    %c0_107 = arith.constant 0 : index
    %359 = vector.load %arg16[%358, %c0_106, %c0_107] : memref<8x8x32xf32, #tpu.memory_space<vmem>>, vector<1x8x32xf32>
    %360 = vector.shape_cast %359 : vector<1x8x32xf32> to vector<8x32xf32>
    %361 = vector.shape_cast %357 : vector<8x32xf32> to vector<1x8x32xf32>
    tpu.vector_store %arg16[%358, %c0_106, %c0_107], %361 {strides = array<i32>} : memref<8x8x32xf32, #tpu.memory_space<vmem>>, vector<1x8x32xf32>,
    %c2_i32_108 = arith.constant 2 : i32
    %362 = arith.index_cast %c2_i32_108 : i32 to index
    %c0_109 = arith.constant 0 : index
    %c0_110 = arith.constant 0 : index
    %363 = vector.load %arg15[%362, %c0_109, %c0_110] : memref<8x8x128xf32, #tpu.memory_space<vmem>>, vector<1x8x128xf32>
    %364 = vector.shape_cast %363 : vector<1x8x128xf32> to vector<8x128xf32>
    %cst_111 = arith.constant dense<0.000000e+00> : vector<8x128xf32>
    %365 = tpu.matmul %357, %292, %cst_111 {dimension_numbers = #tpu.dot_dimension_numbers<[1], [0], [0], [1], [0, 0, 1, 1], [], []>} : vector<8x32xf32>, vector<32x128xf32>, vector<8x128xf32> -> vector<8x128xf32>
    %366 = arith.addf %364, %365 : vector<8x128xf32>
    %367 = vector.extract_strided_slice %366 {offsets = [0, 0], sizes = [8, 32], strides = [1, 1]} : vector<8x128xf32> to vector<8x32xf32>
    %368 = arith.negf %367 : vector<8x32xf32>
    %369 = math.exp %368 : vector<8x32xf32>
    %cst_112 = arith.constant 1.000000e+00 : f32
    %370 = vector.broadcast %cst_112 : f32 to vector<8x32xf32>
    %371 = arith.addf %370, %369 : vector<8x32xf32>
    %372 = arith.divf %370, %371 : vector<8x32xf32>
    %373 = vector.extract_strided_slice %366 {offsets = [0, 32], sizes = [8, 32], strides = [1, 1]} : vector<8x128xf32> to vector<8x32xf32>
    %374 = arith.negf %373 : vector<8x32xf32>
    %375 = math.exp %374 : vector<8x32xf32>
    %cst_113 = arith.constant 1.000000e+00 : f32
    %376 = vector.broadcast %cst_113 : f32 to vector<8x32xf32>
    %377 = arith.addf %376, %375 : vector<8x32xf32>
    %378 = arith.divf %376, %377 : vector<8x32xf32>
    %379 = vector.extract_strided_slice %366 {offsets = [0, 64], sizes = [8, 32], strides = [1, 1]} : vector<8x128xf32> to vector<8x32xf32>
    %380 = math.tanh %379 : vector<8x32xf32>
    %381 = vector.extract_strided_slice %366 {offsets = [0, 96], sizes = [8, 32], strides = [1, 1]} : vector<8x128xf32> to vector<8x32xf32>
    %382 = arith.negf %381 : vector<8x32xf32>
    %383 = math.exp %382 : vector<8x32xf32>
    %cst_114 = arith.constant 1.000000e+00 : f32
    %384 = vector.broadcast %cst_114 : f32 to vector<8x32xf32>
    %385 = arith.addf %384, %383 : vector<8x32xf32>
    %386 = arith.divf %384, %385 : vector<8x32xf32>
    %387 = arith.mulf %378, %355 : vector<8x32xf32>
    %388 = arith.mulf %372, %380 : vector<8x32xf32>
    %389 = arith.addf %387, %388 : vector<8x32xf32>
    %390 = math.tanh %389 : vector<8x32xf32>
    %391 = arith.mulf %386, %390 : vector<8x32xf32>
    %392 = arith.index_cast %c2_i32_108 : i32 to index
    %c0_115 = arith.constant 0 : index
    %c0_116 = arith.constant 0 : index
    %393 = vector.load %arg16[%392, %c0_115, %c0_116] : memref<8x8x32xf32, #tpu.memory_space<vmem>>, vector<1x8x32xf32>
    %394 = vector.shape_cast %393 : vector<1x8x32xf32> to vector<8x32xf32>
    %395 = vector.shape_cast %391 : vector<8x32xf32> to vector<1x8x32xf32>
    tpu.vector_store %arg16[%392, %c0_115, %c0_116], %395 {strides = array<i32>} : memref<8x8x32xf32, #tpu.memory_space<vmem>>, vector<1x8x32xf32>,
    %c3_i32_117 = arith.constant 3 : i32
    %396 = arith.index_cast %c3_i32_117 : i32 to index
    %c0_118 = arith.constant 0 : index
    %c0_119 = arith.constant 0 : index
    %397 = vector.load %arg15[%396, %c0_118, %c0_119] : memref<8x8x128xf32, #tpu.memory_space<vmem>>, vector<1x8x128xf32>
    %398 = vector.shape_cast %397 : vector<1x8x128xf32> to vector<8x128xf32>
    %cst_120 = arith.constant dense<0.000000e+00> : vector<8x128xf32>
    %399 = tpu.matmul %391, %292, %cst_120 {dimension_numbers = #tpu.dot_dimension_numbers<[1], [0], [0], [1], [0, 0, 1, 1], [], []>} : vector<8x32xf32>, vector<32x128xf32>, vector<8x128xf32> -> vector<8x128xf32>
    %400 = arith.addf %398, %399 : vector<8x128xf32>
    %401 = vector.extract_strided_slice %400 {offsets = [0, 0], sizes = [8, 32], strides = [1, 1]} : vector<8x128xf32> to vector<8x32xf32>
    %402 = arith.negf %401 : vector<8x32xf32>
    %403 = math.exp %402 : vector<8x32xf32>
    %cst_121 = arith.constant 1.000000e+00 : f32
    %404 = vector.broadcast %cst_121 : f32 to vector<8x32xf32>
    %405 = arith.addf %404, %403 : vector<8x32xf32>
    %406 = arith.divf %404, %405 : vector<8x32xf32>
    %407 = vector.extract_strided_slice %400 {offsets = [0, 32], sizes = [8, 32], strides = [1, 1]} : vector<8x128xf32> to vector<8x32xf32>
    %408 = arith.negf %407 : vector<8x32xf32>
    %409 = math.exp %408 : vector<8x32xf32>
    %cst_122 = arith.constant 1.000000e+00 : f32
    %410 = vector.broadcast %cst_122 : f32 to vector<8x32xf32>
    %411 = arith.addf %410, %409 : vector<8x32xf32>
    %412 = arith.divf %410, %411 : vector<8x32xf32>
    %413 = vector.extract_strided_slice %400 {offsets = [0, 64], sizes = [8, 32], strides = [1, 1]} : vector<8x128xf32> to vector<8x32xf32>
    %414 = math.tanh %413 : vector<8x32xf32>
    %415 = vector.extract_strided_slice %400 {offsets = [0, 96], sizes = [8, 32], strides = [1, 1]} : vector<8x128xf32> to vector<8x32xf32>
    %416 = arith.negf %415 : vector<8x32xf32>
    %417 = math.exp %416 : vector<8x32xf32>
    %cst_123 = arith.constant 1.000000e+00 : f32
    %418 = vector.broadcast %cst_123 : f32 to vector<8x32xf32>
    %419 = arith.addf %418, %417 : vector<8x32xf32>
    %420 = arith.divf %418, %419 : vector<8x32xf32>
    %421 = arith.mulf %412, %389 : vector<8x32xf32>
    %422 = arith.mulf %406, %414 : vector<8x32xf32>
    %423 = arith.addf %421, %422 : vector<8x32xf32>
    %424 = math.tanh %423 : vector<8x32xf32>
    %425 = arith.mulf %420, %424 : vector<8x32xf32>
    %426 = arith.index_cast %c3_i32_117 : i32 to index
    %c0_124 = arith.constant 0 : index
    %c0_125 = arith.constant 0 : index
    %427 = vector.load %arg16[%426, %c0_124, %c0_125] : memref<8x8x32xf32, #tpu.memory_space<vmem>>, vector<1x8x32xf32>
    %428 = vector.shape_cast %427 : vector<1x8x32xf32> to vector<8x32xf32>
    %429 = vector.shape_cast %425 : vector<8x32xf32> to vector<1x8x32xf32>
    tpu.vector_store %arg16[%426, %c0_124, %c0_125], %429 {strides = array<i32>} : memref<8x8x32xf32, #tpu.memory_space<vmem>>, vector<1x8x32xf32>,
    %c4_i32_126 = arith.constant 4 : i32
    %430 = arith.index_cast %c4_i32_126 : i32 to index
    %c0_127 = arith.constant 0 : index
    %c0_128 = arith.constant 0 : index
    %431 = vector.load %arg15[%430, %c0_127, %c0_128] : memref<8x8x128xf32, #tpu.memory_space<vmem>>, vector<1x8x128xf32>
    %432 = vector.shape_cast %431 : vector<1x8x128xf32> to vector<8x128xf32>
    %cst_129 = arith.constant dense<0.000000e+00> : vector<8x128xf32>
    %433 = tpu.matmul %425, %292, %cst_129 {dimension_numbers = #tpu.dot_dimension_numbers<[1], [0], [0], [1], [0, 0, 1, 1], [], []>} : vector<8x32xf32>, vector<32x128xf32>, vector<8x128xf32> -> vector<8x128xf32>
    %434 = arith.addf %432, %433 : vector<8x128xf32>
    %435 = vector.extract_strided_slice %434 {offsets = [0, 0], sizes = [8, 32], strides = [1, 1]} : vector<8x128xf32> to vector<8x32xf32>
    %436 = arith.negf %435 : vector<8x32xf32>
    %437 = math.exp %436 : vector<8x32xf32>
    %cst_130 = arith.constant 1.000000e+00 : f32
    %438 = vector.broadcast %cst_130 : f32 to vector<8x32xf32>
    %439 = arith.addf %438, %437 : vector<8x32xf32>
    %440 = arith.divf %438, %439 : vector<8x32xf32>
    %441 = vector.extract_strided_slice %434 {offsets = [0, 32], sizes = [8, 32], strides = [1, 1]} : vector<8x128xf32> to vector<8x32xf32>
    %442 = arith.negf %441 : vector<8x32xf32>
    %443 = math.exp %442 : vector<8x32xf32>
    %cst_131 = arith.constant 1.000000e+00 : f32
    %444 = vector.broadcast %cst_131 : f32 to vector<8x32xf32>
    %445 = arith.addf %444, %443 : vector<8x32xf32>
    %446 = arith.divf %444, %445 : vector<8x32xf32>
    %447 = vector.extract_strided_slice %434 {offsets = [0, 64], sizes = [8, 32], strides = [1, 1]} : vector<8x128xf32> to vector<8x32xf32>
    %448 = math.tanh %447 : vector<8x32xf32>
    %449 = vector.extract_strided_slice %434 {offsets = [0, 96], sizes = [8, 32], strides = [1, 1]} : vector<8x128xf32> to vector<8x32xf32>
    %450 = arith.negf %449 : vector<8x32xf32>
    %451 = math.exp %450 : vector<8x32xf32>
    %cst_132 = arith.constant 1.000000e+00 : f32
    %452 = vector.broadcast %cst_132 : f32 to vector<8x32xf32>
    %453 = arith.addf %452, %451 : vector<8x32xf32>
    %454 = arith.divf %452, %453 : vector<8x32xf32>
    %455 = arith.mulf %446, %423 : vector<8x32xf32>
    %456 = arith.mulf %440, %448 : vector<8x32xf32>
    %457 = arith.addf %455, %456 : vector<8x32xf32>
    %458 = math.tanh %457 : vector<8x32xf32>
    %459 = arith.mulf %454, %458 : vector<8x32xf32>
    %460 = arith.index_cast %c4_i32_126 : i32 to index
    %c0_133 = arith.constant 0 : index
    %c0_134 = arith.constant 0 : index
    %461 = vector.load %arg16[%460, %c0_133, %c0_134] : memref<8x8x32xf32, #tpu.memory_space<vmem>>, vector<1x8x32xf32>
    %462 = vector.shape_cast %461 : vector<1x8x32xf32> to vector<8x32xf32>
    %463 = vector.shape_cast %459 : vector<8x32xf32> to vector<1x8x32xf32>
    tpu.vector_store %arg16[%460, %c0_133, %c0_134], %463 {strides = array<i32>} : memref<8x8x32xf32, #tpu.memory_space<vmem>>, vector<1x8x32xf32>,
    %c5_i32_135 = arith.constant 5 : i32
    %464 = arith.index_cast %c5_i32_135 : i32 to index
    %c0_136 = arith.constant 0 : index
    %c0_137 = arith.constant 0 : index
    %465 = vector.load %arg15[%464, %c0_136, %c0_137] : memref<8x8x128xf32, #tpu.memory_space<vmem>>, vector<1x8x128xf32>
    %466 = vector.shape_cast %465 : vector<1x8x128xf32> to vector<8x128xf32>
    %cst_138 = arith.constant dense<0.000000e+00> : vector<8x128xf32>
    %467 = tpu.matmul %459, %292, %cst_138 {dimension_numbers = #tpu.dot_dimension_numbers<[1], [0], [0], [1], [0, 0, 1, 1], [], []>} : vector<8x32xf32>, vector<32x128xf32>, vector<8x128xf32> -> vector<8x128xf32>
    %468 = arith.addf %466, %467 : vector<8x128xf32>
    %469 = vector.extract_strided_slice %468 {offsets = [0, 0], sizes = [8, 32], strides = [1, 1]} : vector<8x128xf32> to vector<8x32xf32>
    %470 = arith.negf %469 : vector<8x32xf32>
    %471 = math.exp %470 : vector<8x32xf32>
    %cst_139 = arith.constant 1.000000e+00 : f32
    %472 = vector.broadcast %cst_139 : f32 to vector<8x32xf32>
    %473 = arith.addf %472, %471 : vector<8x32xf32>
    %474 = arith.divf %472, %473 : vector<8x32xf32>
    %475 = vector.extract_strided_slice %468 {offsets = [0, 32], sizes = [8, 32], strides = [1, 1]} : vector<8x128xf32> to vector<8x32xf32>
    %476 = arith.negf %475 : vector<8x32xf32>
    %477 = math.exp %476 : vector<8x32xf32>
    %cst_140 = arith.constant 1.000000e+00 : f32
    %478 = vector.broadcast %cst_140 : f32 to vector<8x32xf32>
    %479 = arith.addf %478, %477 : vector<8x32xf32>
    %480 = arith.divf %478, %479 : vector<8x32xf32>
    %481 = vector.extract_strided_slice %468 {offsets = [0, 64], sizes = [8, 32], strides = [1, 1]} : vector<8x128xf32> to vector<8x32xf32>
    %482 = math.tanh %481 : vector<8x32xf32>
    %483 = vector.extract_strided_slice %468 {offsets = [0, 96], sizes = [8, 32], strides = [1, 1]} : vector<8x128xf32> to vector<8x32xf32>
    %484 = arith.negf %483 : vector<8x32xf32>
    %485 = math.exp %484 : vector<8x32xf32>
    %cst_141 = arith.constant 1.000000e+00 : f32
    %486 = vector.broadcast %cst_141 : f32 to vector<8x32xf32>
    %487 = arith.addf %486, %485 : vector<8x32xf32>
    %488 = arith.divf %486, %487 : vector<8x32xf32>
    %489 = arith.mulf %480, %457 : vector<8x32xf32>
    %490 = arith.mulf %474, %482 : vector<8x32xf32>
    %491 = arith.addf %489, %490 : vector<8x32xf32>
    %492 = math.tanh %491 : vector<8x32xf32>
    %493 = arith.mulf %488, %492 : vector<8x32xf32>
    %494 = arith.index_cast %c5_i32_135 : i32 to index
    %c0_142 = arith.constant 0 : index
    %c0_143 = arith.constant 0 : index
    %495 = vector.load %arg16[%494, %c0_142, %c0_143] : memref<8x8x32xf32, #tpu.memory_space<vmem>>, vector<1x8x32xf32>
    %496 = vector.shape_cast %495 : vector<1x8x32xf32> to vector<8x32xf32>
    %497 = vector.shape_cast %493 : vector<8x32xf32> to vector<1x8x32xf32>
    tpu.vector_store %arg16[%494, %c0_142, %c0_143], %497 {strides = array<i32>} : memref<8x8x32xf32, #tpu.memory_space<vmem>>, vector<1x8x32xf32>,
    %c6_i32_144 = arith.constant 6 : i32
    %498 = arith.index_cast %c6_i32_144 : i32 to index
    %c0_145 = arith.constant 0 : index
    %c0_146 = arith.constant 0 : index
    %499 = vector.load %arg15[%498, %c0_145, %c0_146] : memref<8x8x128xf32, #tpu.memory_space<vmem>>, vector<1x8x128xf32>
    %500 = vector.shape_cast %499 : vector<1x8x128xf32> to vector<8x128xf32>
    %cst_147 = arith.constant dense<0.000000e+00> : vector<8x128xf32>
    %501 = tpu.matmul %493, %292, %cst_147 {dimension_numbers = #tpu.dot_dimension_numbers<[1], [0], [0], [1], [0, 0, 1, 1], [], []>} : vector<8x32xf32>, vector<32x128xf32>, vector<8x128xf32> -> vector<8x128xf32>
    %502 = arith.addf %500, %501 : vector<8x128xf32>
    %503 = vector.extract_strided_slice %502 {offsets = [0, 0], sizes = [8, 32], strides = [1, 1]} : vector<8x128xf32> to vector<8x32xf32>
    %504 = arith.negf %503 : vector<8x32xf32>
    %505 = math.exp %504 : vector<8x32xf32>
    %cst_148 = arith.constant 1.000000e+00 : f32
    %506 = vector.broadcast %cst_148 : f32 to vector<8x32xf32>
    %507 = arith.addf %506, %505 : vector<8x32xf32>
    %508 = arith.divf %506, %507 : vector<8x32xf32>
    %509 = vector.extract_strided_slice %502 {offsets = [0, 32], sizes = [8, 32], strides = [1, 1]} : vector<8x128xf32> to vector<8x32xf32>
    %510 = arith.negf %509 : vector<8x32xf32>
    %511 = math.exp %510 : vector<8x32xf32>
    %cst_149 = arith.constant 1.000000e+00 : f32
    %512 = vector.broadcast %cst_149 : f32 to vector<8x32xf32>
    %513 = arith.addf %512, %511 : vector<8x32xf32>
    %514 = arith.divf %512, %513 : vector<8x32xf32>
    %515 = vector.extract_strided_slice %502 {offsets = [0, 64], sizes = [8, 32], strides = [1, 1]} : vector<8x128xf32> to vector<8x32xf32>
    %516 = math.tanh %515 : vector<8x32xf32>
    %517 = vector.extract_strided_slice %502 {offsets = [0, 96], sizes = [8, 32], strides = [1, 1]} : vector<8x128xf32> to vector<8x32xf32>
    %518 = arith.negf %517 : vector<8x32xf32>
    %519 = math.exp %518 : vector<8x32xf32>
    %cst_150 = arith.constant 1.000000e+00 : f32
    %520 = vector.broadcast %cst_150 : f32 to vector<8x32xf32>
    %521 = arith.addf %520, %519 : vector<8x32xf32>
    %522 = arith.divf %520, %521 : vector<8x32xf32>
    %523 = arith.mulf %514, %491 : vector<8x32xf32>
    %524 = arith.mulf %508, %516 : vector<8x32xf32>
    %525 = arith.addf %523, %524 : vector<8x32xf32>
    %526 = math.tanh %525 : vector<8x32xf32>
    %527 = arith.mulf %522, %526 : vector<8x32xf32>
    %528 = arith.index_cast %c6_i32_144 : i32 to index
    %c0_151 = arith.constant 0 : index
    %c0_152 = arith.constant 0 : index
    %529 = vector.load %arg16[%528, %c0_151, %c0_152] : memref<8x8x32xf32, #tpu.memory_space<vmem>>, vector<1x8x32xf32>
    %530 = vector.shape_cast %529 : vector<1x8x32xf32> to vector<8x32xf32>
    %531 = vector.shape_cast %527 : vector<8x32xf32> to vector<1x8x32xf32>
    tpu.vector_store %arg16[%528, %c0_151, %c0_152], %531 {strides = array<i32>} : memref<8x8x32xf32, #tpu.memory_space<vmem>>, vector<1x8x32xf32>,
    %c7_i32_153 = arith.constant 7 : i32
    %532 = arith.index_cast %c7_i32_153 : i32 to index
    %c0_154 = arith.constant 0 : index
    %c0_155 = arith.constant 0 : index
    %533 = vector.load %arg15[%532, %c0_154, %c0_155] : memref<8x8x128xf32, #tpu.memory_space<vmem>>, vector<1x8x128xf32>
    %534 = vector.shape_cast %533 : vector<1x8x128xf32> to vector<8x128xf32>
    %cst_156 = arith.constant dense<0.000000e+00> : vector<8x128xf32>
    %535 = tpu.matmul %527, %292, %cst_156 {dimension_numbers = #tpu.dot_dimension_numbers<[1], [0], [0], [1], [0, 0, 1, 1], [], []>} : vector<8x32xf32>, vector<32x128xf32>, vector<8x128xf32> -> vector<8x128xf32>
    %536 = arith.addf %534, %535 : vector<8x128xf32>
    %537 = vector.extract_strided_slice %536 {offsets = [0, 0], sizes = [8, 32], strides = [1, 1]} : vector<8x128xf32> to vector<8x32xf32>
    %538 = arith.negf %537 : vector<8x32xf32>
    %539 = math.exp %538 : vector<8x32xf32>
    %cst_157 = arith.constant 1.000000e+00 : f32
    %540 = vector.broadcast %cst_157 : f32 to vector<8x32xf32>
    %541 = arith.addf %540, %539 : vector<8x32xf32>
    %542 = arith.divf %540, %541 : vector<8x32xf32>
    %543 = vector.extract_strided_slice %536 {offsets = [0, 32], sizes = [8, 32], strides = [1, 1]} : vector<8x128xf32> to vector<8x32xf32>
    %544 = arith.negf %543 : vector<8x32xf32>
    %545 = math.exp %544 : vector<8x32xf32>
    %cst_158 = arith.constant 1.000000e+00 : f32
    %546 = vector.broadcast %cst_158 : f32 to vector<8x32xf32>
    %547 = arith.addf %546, %545 : vector<8x32xf32>
    %548 = arith.divf %546, %547 : vector<8x32xf32>
    %549 = vector.extract_strided_slice %536 {offsets = [0, 64], sizes = [8, 32], strides = [1, 1]} : vector<8x128xf32> to vector<8x32xf32>
    %550 = math.tanh %549 : vector<8x32xf32>
    %551 = vector.extract_strided_slice %536 {offsets = [0, 96], sizes = [8, 32], strides = [1, 1]} : vector<8x128xf32> to vector<8x32xf32>
    %552 = arith.negf %551 : vector<8x32xf32>
    %553 = math.exp %552 : vector<8x32xf32>
    %cst_159 = arith.constant 1.000000e+00 : f32
    %554 = vector.broadcast %cst_159 : f32 to vector<8x32xf32>
    %555 = arith.addf %554, %553 : vector<8x32xf32>
    %556 = arith.divf %554, %555 : vector<8x32xf32>
    %557 = arith.mulf %548, %525 : vector<8x32xf32>
    %558 = arith.mulf %542, %550 : vector<8x32xf32>
    %559 = arith.addf %557, %558 : vector<8x32xf32>
    %560 = math.tanh %559 : vector<8x32xf32>
    %561 = arith.mulf %556, %560 : vector<8x32xf32>
    %562 = arith.index_cast %c7_i32_153 : i32 to index
    %c0_160 = arith.constant 0 : index
    %c0_161 = arith.constant 0 : index
    %563 = vector.load %arg16[%562, %c0_160, %c0_161] : memref<8x8x32xf32, #tpu.memory_space<vmem>>, vector<1x8x32xf32>
    %564 = vector.shape_cast %563 : vector<1x8x32xf32> to vector<8x32xf32>
    %565 = vector.shape_cast %561 : vector<8x32xf32> to vector<1x8x32xf32>
    tpu.vector_store %arg16[%562, %c0_160, %c0_161], %565 {strides = array<i32>} : memref<8x8x32xf32, #tpu.memory_space<vmem>>, vector<1x8x32xf32>,
    %c8_i32_162 = arith.constant 8 : i32
    %c0_163 = arith.constant 0 : index
    %c0_164 = arith.constant 0 : index
    %c0_165 = arith.constant 0 : index
    %566 = vector.load %arg16[%c0_163, %c0_164, %c0_165] : memref<8x8x32xf32, #tpu.memory_space<vmem>>, vector<8x8x32xf32>
    %567 = vector.shape_cast %566 : vector<8x8x32xf32> to vector<64x32xf32>
    %c0_166 = arith.constant 0 : index
    %c0_167 = arith.constant 0 : index
    %568 = vector.load %arg8[%c0_166, %c0_167] : memref<32x16xf32, #tpu.memory_space<vmem>>, vector<32x16xf32>
    %cst_168 = arith.constant dense<0.000000e+00> : vector<64x16xf32>
    %569 = tpu.matmul %567, %568, %cst_168 {dimension_numbers = #tpu.dot_dimension_numbers<[1], [0], [0], [1], [0, 0, 1, 1], [], []>} : vector<64x32xf32>, vector<32x16xf32>, vector<64x16xf32> -> vector<64x16xf32>
    %c0_169 = arith.constant 0 : index
    %c0_170 = arith.constant 0 : index
    %570 = vector.load %arg9[%c0_169, %c0_170] : memref<1x16xf32, #tpu.memory_space<vmem>>, vector<1x16xf32>
    %571 = vector.broadcast %570 : vector<1x16xf32> to vector<64x16xf32>
    %572 = arith.addf %569, %571 : vector<64x16xf32>
    %573 = vector.shape_cast %572 : vector<64x16xf32> to vector<8x8x16xf32>
    %c0_171 = arith.constant 0 : index
    %c0_172 = arith.constant 0 : index
    %c0_173 = arith.constant 0 : index
    %574 = vector.load %arg13[%c0_171, %c0_172, %c0_173] : memref<8x8x16xf32, #tpu.memory_space<vmem>>, vector<8x8x16xf32>
    tpu.vector_store %arg13[%c0_171, %c0_172, %c0_173], %573 {strides = array<i32>} : memref<8x8x16xf32, #tpu.memory_space<vmem>>, vector<8x8x16xf32>,
    %c0_174 = arith.constant 0 : index
    %c0_175 = arith.constant 0 : index
    %c0_176 = arith.constant 0 : index
    %575 = vector.load %arg1[%c0_174, %c0_175, %c0_176] : memref<8x8x8xf32, #tpu.memory_space<vmem>>, vector<8x8x8xf32>
    %576 = vector.shape_cast %575 : vector<8x8x8xf32> to vector<64x8xf32>
    %c0_177 = arith.constant 0 : index
    %c0_178 = arith.constant 0 : index
    %577 = vector.load %arg10[%c0_177, %c0_178] : memref<32x12xf32, #tpu.memory_space<vmem>>, vector<32x12xf32>
    %cst_179 = arith.constant dense<0.000000e+00> : vector<64x12xf32>
    %578 = tpu.matmul %567, %577, %cst_179 {dimension_numbers = #tpu.dot_dimension_numbers<[1], [0], [0], [1], [0, 0, 1, 1], [], []>} : vector<64x32xf32>, vector<32x12xf32>, vector<64x12xf32> -> vector<64x12xf32>
    %c0_180 = arith.constant 0 : index
    %c0_181 = arith.constant 0 : index
    %579 = vector.load %arg11[%c0_180, %c0_181] : memref<8x12xf32, #tpu.memory_space<vmem>>, vector<8x12xf32>
    %cst_182 = arith.constant dense<0.000000e+00> : vector<64x12xf32>
    %580 = tpu.matmul %576, %579, %cst_182 {dimension_numbers = #tpu.dot_dimension_numbers<[1], [0], [0], [1], [0, 0, 1, 1], [], []>} : vector<64x8xf32>, vector<8x12xf32>, vector<64x12xf32> -> vector<64x12xf32>
    %581 = arith.addf %578, %580 : vector<64x12xf32>
    %c0_183 = arith.constant 0 : index
    %c0_184 = arith.constant 0 : index
    %582 = vector.load %arg12[%c0_183, %c0_184] : memref<1x12xf32, #tpu.memory_space<vmem>>, vector<1x12xf32>
    %583 = vector.broadcast %582 : vector<1x12xf32> to vector<64x12xf32>
    %584 = arith.addf %581, %583 : vector<64x12xf32>
    %585 = vector.shape_cast %584 : vector<64x12xf32> to vector<8x8x12xf32>
    %c0_185 = arith.constant 0 : index
    %c0_186 = arith.constant 0 : index
    %c0_187 = arith.constant 0 : index
    %586 = vector.load %arg14[%c0_185, %c0_186, %c0_187] : memref<8x8x12xf32, #tpu.memory_space<vmem>>, vector<8x8x12xf32>
    tpu.vector_store %arg14[%c0_185, %c0_186, %c0_187], %585 {strides = array<i32>} : memref<8x8x12xf32, #tpu.memory_space<vmem>>, vector<8x8x12xf32>,
    return
  }
}

</mosaic_0001>

<bundles_post_ra>
// kernel: decoder_forward.1
= control target key start
LH: loop header
LB: loop body
LE: loop exit
PB: predicated region body
PF: predicated region fallthrough
CT: control target
= control target key end

     0   :  { %vm63_vm0 = vcmask 130048   ;;  %v3203_v3 = vmov 0.0|0.0   ;;  %vm3204_vm1 = vmmov 0   ;;  %v3205_v4 = vmov 0.0   ;;  %s3207_s23 = smov 32   ;;  %s3811_s2 = inlined_call_operand.vmem [shape: f32[16,128], index: 2, kind: input, shape index: {}]   ;;  %s3812_s0 = inlined_call_operand.vmem [shape: f32[8,8,16], index: 0, kind: input, shape index: {}]   ;;  %s3813_s3 = inlined_call_operand.vmem [shape: f32[32,128], index: 3, kind: input, shape index: {}]   ;;  %s3814_s4 = inlined_call_operand.vmem [shape: f32[1,128], index: 4, kind: input, shape index: {}]   ;;  %s3815_s5 = inlined_call_operand.vmem [shape: f32[32,128], index: 5, kind: input, shape index: {}]   ;;  %s3816_s6 = inlined_call_operand.vmem [shape: f32[32,128], index: 6, kind: input, shape index: {}]   ;;  %s3817_s7 = inlined_call_operand.vmem [shape: f32[1,128], index: 7, kind: input, shape index: {}]   ;;  %s3818_s8 = inlined_call_operand.vmem [shape: f32[32,16], index: 8, kind: input, shape index: {}]   ;;  %s3819_s9 = inlined_call_operand.vmem [shape: f32[1,16], index: 9, kind: input, shape index: {}]   ;;  %s3820_s13 = inlined_call_operand.vmem [shape: f32[8,8,16], index: 13, kind: output, shape index: {0}]   ;;  %s3821_s11 = inlined_call_operand.vmem [shape: f32[8,12], index: 11, kind: input, shape index: {}]   ;;  %s3822_s10 = inlined_call_operand.vmem [shape: f32[32,12], index: 10, kind: input, shape index: {}]   ;;  %s3823_s1 = inlined_call_operand.vmem [shape: f32[8,8,8], index: 1, kind: input, shape index: {}]   ;;  %s3824_s12 = inlined_call_operand.vmem [shape: f32[1,12], index: 12, kind: input, shape index: {}]   ;;  %s3825_s14 = inlined_call_operand.vmem [shape: f32[8,8,12], index: 14, kind: output, shape index: {1}]  }
   0x1   :  { %v54_v0 = vld [vmem:[%s3811_s2] sm:$0xff]  ;;  %v55_v1 = vld [vmem:[%s3811_s2 + $0x8] sm:$0xff]  ;;  %2948 = vmatprep.subr.bf16.mxu1 %v3203_v3  ;;  %2707 = vmatprep.mubr.msk.f32.mxu1 %vm3204_vm1, %v3205_v4  ;;  %v203_v10 = vld [vmem:[%s3813_s3 + $0x10] sm:$0xff]  ;;  %vm206_vm2 = vcmask 261120   ;;  %vm2196_vm3 = vcmask 64512   ;;  %vm2446_vm4 = vcmask 97280  }
   0x2   :  { %v46_v2 = vld [vmem:[%s3812_s0] sm:$0xff]  ;;  %v2938_v5 = vpack.c.bf16 %v55_v1, %v54_v0  ;;  %v202_v7 = vld [vmem:[%s3813_s3 + $0x8] sm:$0xff]  ;;  %v204_v11 = vld [vmem:[%s3813_s3 + $0x18] sm:$0xff] }
   0x3   :  { %2676 = vmatprep.mubr.msk.f32.mxu0 %vm63_vm0, %v46_v2  ;;  %v201_v6 = vld [vmem:[%s3813_s3] sm:$0xff]  ;;  %v47_v9 = vld [vmem:[%s3812_s0 + $0x8] sm:$0xff]  ;;  %v48_v12 = vld [vmem:[%s3812_s0 + $0x10] sm:$0xff]  ;;  %v3320_v13 = vpack.c.bf16 %v204_v11, %v203_v10 }
   0x4   :  { %v3302_v8 = vpack.c.bf16 %v202_v7, %v201_v6  ;;  %2939 = vmatprep.subr.bf16.mxu0 %v2938_v5  ;;  %v49_v14 = vld [vmem:[%s3812_s0 + $0x18] sm:$0xff]  ;;  %v50_v15 = vld [vmem:[%s3812_s0 + $0x20] sm:$0xff]  ;;  %v51_v16 = vld [vmem:[%s3812_s0 + $0x28] sm:$0xff] }
   0x5   :  { %2941 = vmatpush3.bf16.msra.mxu0 %v2938_v5  ;;  %v52_v17 = vld [vmem:[%s3812_s0 + $0x30] sm:$0xff]  ;;  %v53_v18 = vld [vmem:[%s3812_s0 + $0x38] sm:$0xff]  ;;  %v2463_v19 = vld [vmem:[%s3814_s4] ss:$0 sm:$0xff]  ;;  %s3206_s4 = smov 64  }
   0x6   :  { %2950 = vmatpush3.bf16.msra.mxu1 %v3302_v8  ;;  %2942 = vmatprep.subr.bf16.mxu0 %v3203_v3 }
   0x7   :  { %2951 = vmatprep.subr.bf16.mxu1 %v3203_v3 }
   0x8   :  { %2677 = vmatmul.mubr.msk.f32.vlgmr.msra.gmra.mrb[0].mxu0 %vm63_vm0, %v47_v9 }
   0x9   :  { %2944 = vmatpush3.bf16.msra.mxu0 %v3302_v8  ;;  %2679 = vmatprep.mubr.msk.f32.mxu0 %vm63_vm0, %v48_v12 }
   0xa   :  { %2945 = vmatprep.subr.bf16.mxu0 %v3203_v3  ;;  %2953 = vmatpush3.bf16.msra.mxu1 %v3320_v13 }
   0xb   :  { %2960 = vmatprep.subr.bf16.mxu1 %v3203_v3 }
   0xc   :  { %2680 = vmatmul.mubr.msk.f32.gmra.mrb[2].mxu0 %vm63_vm0, %v49_v14 }
   0xd   :  { %2682 = vmatprep.mubr.msk.f32.mxu0 %vm63_vm0, %v50_v15  ;;  %2947 = vmatpush3.bf16.msra.mxu0 %v3320_v13 }
   0xe   :  { %2954 = vmatprep.subr.bf16.mxu0 %v3203_v3 }
  0x10   :  { %2683 = vmatmul.mubr.msk.f32.gmra.mrb[4].mxu0 %vm63_vm0, %v51_v16 }
  0x11   :  { %2685 = vmatprep.mubr.msk.f32.mxu0 %vm63_vm0, %v52_v17 }
  0x14   :  { %2686 = vmatmul.mubr.msk.f32.gmra.mrb[6].mxu0 %vm63_vm0, %v53_v18 }
  0x15   :  { %2696 = vmatprep.mubr.msk.f32.mxu0 %vm3204_vm1, %v3205_v4 }
  0x18   :  { %2697 = vmatmul.mubr.f32.vlgmr.msra.gmra.mrb[8].mxu0 %v3205_v4 }
  0x19   :  { %2956 = vmatpush3.bf16.msra.mxu0 %v3302_v8  ;;  %2718 = vmatprep.mubr.msk.f32.mxu0 %vm3204_vm1, %v3205_v4 }
  0x1a   :  { %2957 = vmatprep.subr.bf16.mxu0 %v3203_v3 }
  0x1d   :  { %2959 = vmatpush3.bf16.msra.mxu0 %v3320_v13 }
  0x1e   :  { %2966 = vmatprep.subr.bf16.mxu0 %v3203_v3 }
  0xdb   :  { %v2678_v20 = vpop.f32.mrb[0].mxu0 }
  0xdc   :  { %v160_v21 = vadd.f32 %v2678_v20, %v2463_v19  ;;  %v154_v22 = vpop.f32.mrb[1].mxu0 }
  0xdd   :  { %v155_v35 = vadd.f32 %v2463_v19, %v154_v22 }
  0xdf   :  { %v2681_v23 = vpop.f32.mrb[2].mxu0 }
  0xe0   :  { %v3361_v24 = vadd.f32 %v2681_v23, %v2463_v19  ;;  %v164_v25 = vpop.f32.mrb[3].mxu0 }
  0xe1   :  { %v3363_v26 = vadd.f32 %v2463_v19, %v164_v25 }
  0xe3   :  { %v2684_v27 = vpop.f32.mrb[4].mxu0 }
  0xe4   :  { %v3365_v28 = vadd.f32 %v2684_v27, %v2463_v19  ;;  %v174_v29 = vpop.f32.mrb[5].mxu0 }
  0xe5   :  { %v3367_v30 = vadd.f32 %v2463_v19, %v174_v29 }
  0xe7   :  { %v2687_v31 = vpop.f32.mrb[6].mxu0 }
  0xe8   :  { %v3369_v32 = vadd.f32 %v2687_v31, %v2463_v19  ;;  %v184_v33 = vpop.f32.mrb[7].mxu0 }
  0xe9   :  { %v3371_v34 = vadd.f32 %v2463_v19, %v184_v33 }
  0xeb   :  { %v276_v36 = vpop.f32.mrb[8].mxu0 }
  0xec   :  { %v280_v37 = vadd.f32 %v276_v36, %v155_v35  ;;  %v2698_v38 = vpop.f32.mrb[9].mxu0 }
  0xee   :  { %3075 = vtanh.f32 %v280_v37  ;;  %v2472_v40 = vmul.f32 -1.442695, %v280_v37 }
  0xf0   :  { %3077 = vpow2.f32 %v2472_v40 }
  0xf8   :  { %v3076_v39 = vpop.eup %3075 }
  0xf9   :  { %290 = vrot.lane.b32.xlu0 %v3076_v39, %s3206_s4 }
  0xfa   :  { %v3078_v41 = vpop.eup %3077 }
  0xfb   :  { %v284_v42 = vadd.f32 1.0, %v3078_v41 }
  0xfd   :  { %3079 = vrcp.f32 %v284_v42 }
 0x107   :  { %v3080_v43 = vpop.eup %3079 }
 0x108   :  { %v288_v46 = vmul.f32 0.0, %v3080_v43 }
 0x16b   :  { %v291_v44 = vpop.permute.xlu0 %290 }
 0x16c   :  { %v293_v45 = vmul.f32 %v3080_v43, %v291_v44 }
 0x16e   :  { %295 = vrot.lane.b32.xlu0 %v293_v45, %s3207_s23 }
 0x1e0   :  { %v296_v47 = vpop.permute.xlu0 %295 }
 0x1e1   :  { %v298_v48 = vadd.f32 %v296_v47, %v288_v46 }
 0x1e3   :  { %3081 = vtanh.f32 %v298_v48 }
 0x1ed   :  { %v3082_v49 = vpop.eup %3081 }
 0x1ee   :  { %301 = vrot.lane.b32.xlu1 %v3082_v49, %s3206_s4 }
 0x260   :  { %v302_v50 = vpop.permute.xlu1 %301 }
 0x261   :  { %v304_v51 = vmul.f32 %v3080_v43, %v302_v50 }
 0x263   :  { %306 = vrot.lane.b32.xlu1 %v304_v51, %s3207_s23 }
 0x2d5   :  { %v307_v52 = vpop.permute.xlu1 %306 }
 0x2d6   :  { %309 = vst.msk [vmem:[#allocation3] sm:$0xff] %vm206_vm2, %v307_v52  ;;  %2708 = vmatmul.mubr.msk.f32.vlgmr.msra.gmra.mrb[0].mxu1 %vm206_vm2, %v307_v52 }
 0x2d7   :  { %2962 = vmatpush3.bf16.msra.mxu1 %v3302_v8  ;;  %2729 = vmatprep.mubr.msk.f32.mxu1 %vm3204_vm1, %v3205_v4 }
 0x2d8   :  { %2963 = vmatprep.subr.bf16.mxu1 %v3203_v3 }
 0x2db   :  { %2965 = vmatpush3.bf16.msra.mxu1 %v3320_v13 }
 0x2dc   :  { %2972 = vmatprep.subr.bf16.mxu1 %v3203_v3 }
 0x3a9   :  { %v380_v53 = vpop.f32.mrb[0].mxu1 }
 0x3aa   :  { %v384_v54 = vadd.f32 %v380_v53, %v160_v21  ;;  %v2709_v55 = vpop.f32.mrb[1].mxu1 }
 0x3ac   :  { %3083 = vtanh.f32 %v384_v54  ;;  %v2474_v57 = vmul.f32 -1.442695, %v384_v54 }
 0x3ae   :  { %3085 = vpow2.f32 %v2474_v57 }
 0x3b6   :  { %v3084_v56 = vpop.eup %3083 }
 0x3b7   :  { %394 = vrot.lane.b32.xlu0 %v3084_v56, %s3206_s4 }
 0x3b8   :  { %v3086_v58 = vpop.eup %3085 }
 0x3b9   :  { %v388_v59 = vadd.f32 1.0, %v3086_v58 }
 0x3bb   :  { %3087 = vrcp.f32 %v388_v59 }
 0x3c5   :  { %v3088_v60 = vpop.eup %3087 }
 0x3c6   :  { %v392_v63 = vmul.f32 %v3088_v60, %v298_v48 }
 0x429   :  { %v395_v61 = vpop.permute.xlu0 %394 }
 0x42a   :  { %v397_v62 = vmul.f32 %v3088_v60, %v395_v61 }
 0x42c   :  { %399 = vrot.lane.b32.xlu1 %v397_v62, %s3207_s23 }
 0x49e   :  { %v400_v0 = vpop.permute.xlu1 %399 }
 0x49f   :  { %v402_v1 = vadd.f32 %v400_v0, %v392_v63 }
 0x4a1   :  { %3089 = vtanh.f32 %v402_v1 }
 0x4ab   :  { %v3090_v2 = vpop.eup %3089 }
 0x4ac   :  { %405 = vrot.lane.b32.xlu0 %v3090_v2, %s3206_s4 }
 0x51e   :  { %v406_v5 = vpop.permute.xlu0 %405 }
 0x51f   :  { %v408_v6 = vmul.f32 %v3088_v60, %v406_v5 }
 0x521   :  { %410 = vrot.lane.b32.xlu1 %v408_v6, %s3207_s23 }
 0x593   :  { %v411_v7 = vpop.permute.xlu1 %410 }
 0x594   :  { %414 = vst.msk [vmem:[#allocation3 + $0x8] sm:$0xff] %vm206_vm2, %v411_v7  ;;  %2719 = vmatmul.mubr.msk.f32.vlgmr.msra.gmra.mrb[10].mxu0 %vm206_vm2, %v411_v7 }
 0x595   :  { %2968 = vmatpush3.bf16.msra.mxu0 %v3302_v8  ;;  %2740 = vmatprep.mubr.msk.f32.mxu0 %vm3204_vm1, %v3205_v4 }
 0x596   :  { %2969 = vmatprep.subr.bf16.mxu0 %v3203_v3 }
 0x599   :  { %2971 = vmatpush3.bf16.msra.mxu0 %v3320_v13 }
 0x59a   :  { %2978 = vmatprep.subr.bf16.mxu0 %v3203_v3 }
 0x667   :  { %v485_v9 = vpop.f32.mrb[10].mxu0 }
 0x668   :  { %v489_v10 = vadd.f32 %v485_v9, %v3363_v26  ;;  %v2720_v11 = vpop.f32.mrb[11].mxu0 }
 0x66a   :  { %3091 = vtanh.f32 %v489_v10  ;;  %v2476_v14 = vmul.f32 -1.442695, %v489_v10 }
 0x66c   :  { %3093 = vpow2.f32 %v2476_v14 }
 0x674   :  { %v3092_v12 = vpop.eup %3091 }
 0x675   :  { %499 = vrot.lane.b32.xlu0 %v3092_v12, %s3206_s4 }
 0x676   :  { %v3094_v15 = vpop.eup %3093 }
 0x677   :  { %v493_v16 = vadd.f32 1.0, %v3094_v15  ;;  %v1054_v15 = vld [vmem:[%s3815_s5 + $0x8] sm:$0xff] }
 0x679   :  { %3095 = vrcp.f32 %v493_v16 }
 0x683   :  { %v3096_v17 = vpop.eup %3095 }
 0x684   :  { %v497_v20 = vmul.f32 %v3096_v17, %v402_v1 }
 0x6e7   :  { %v500_v18 = vpop.permute.xlu0 %499 }
 0x6e8   :  { %v502_v19 = vmul.f32 %v3096_v17, %v500_v18 }
 0x6ea   :  { %504 = vrot.lane.b32.xlu1 %v502_v19, %s3207_s23 }
 0x75c   :  { %v505_v21 = vpop.permute.xlu1 %504 }
 0x75d   :  { %v507_v22 = vadd.f32 %v505_v21, %v497_v20  ;;  %v1055_v20 = vld [vmem:[%s3815_s5 + $0x10] sm:$0xff]  ;;  %v1056_v21 = vld [vmem:[%s3815_s5 + $0x18] sm:$0xff] }
 0x75f   :  { %3097 = vtanh.f32 %v507_v22 }
 0x769   :  { %v3098_v23 = vpop.eup %3097 }
 0x76a   :  { %510 = vrot.lane.b32.xlu0 %v3098_v23, %s3206_s4 }
 0x7dc   :  { %v511_v25 = vpop.permute.xlu0 %510 }
 0x7dd   :  { %v513_v26 = vmul.f32 %v3096_v17, %v511_v25  ;;  %v1045_v25 = vld [vmem:[#allocation3] sm:$0xff] }
 0x7df   :  { %515 = vrot.lane.b32.xlu1 %v513_v26, %s3207_s23  ;;  %v1046_v26 = vld [vmem:[#allocation3 + $0x8] sm:$0xff] }
 0x851   :  { %v516_v27 = vpop.permute.xlu1 %515 }
 0x852   :  { %519 = vst.msk [vmem:[#allocation3 + $0x10] sm:$0xff] %vm206_vm2, %v516_v27  ;;  %2730 = vmatmul.mubr.msk.f32.vlgmr.msra.gmra.mrb[2].mxu1 %vm206_vm2, %v516_v27 }
 0x853   :  { %2974 = vmatpush3.bf16.msra.mxu1 %v3302_v8  ;;  %2751 = vmatprep.mubr.msk.f32.mxu1 %vm3204_vm1, %v3205_v4 }
 0x854   :  { %2975 = vmatprep.subr.bf16.mxu1 %v3203_v3 }
 0x857   :  { %2977 = vmatpush3.bf16.msra.mxu1 %v3320_v13 }
 0x858   :  { %2984 = vmatprep.subr.bf16.mxu1 %v3203_v3 }
 0x859   :  { %v1047_v27 = vld [vmem:[#allocation3 + $0x10] sm:$0xff] }
 0x925   :  { %v590_v29 = vpop.f32.mrb[2].mxu1 }
 0x926   :  { %v594_v31 = vadd.f32 %v590_v29, %v3361_v24  ;;  %v2731_v33 = vpop.f32.mrb[3].mxu1 }
 0x928   :  { %3099 = vtanh.f32 %v594_v31  ;;  %v2478_v36 = vmul.f32 -1.442695, %v594_v31 }
 0x92a   :  { %3101 = vpow2.f32 %v2478_v36 }
 0x932   :  { %v3100_v35 = vpop.eup %3099 }
 0x933   :  { %604 = vrot.lane.b32.xlu0 %v3100_v35, %s3206_s4 }
 0x934   :  { %v3102_v37 = vpop.eup %3101 }
 0x935   :  { %v598_v38 = vadd.f32 1.0, %v3102_v37 }
 0x937   :  { %3103 = vrcp.f32 %v598_v38 }
 0x941   :  { %v3104_v39 = vpop.eup %3103 }
 0x942   :  { %v602_v42 = vmul.f32 %v3104_v39, %v507_v22  ;;  %v2994_v22 = vpack.c.bf16 %v1056_v21, %v1055_v20 }
 0x9a5   :  { %v605_v40 = vpop.permute.xlu0 %604 }
 0x9a6   :  { %v607_v41 = vmul.f32 %v3104_v39, %v605_v40 }
 0x9a8   :  { %609 = vrot.lane.b32.xlu1 %v607_v41, %s3207_s23 }
 0xa1a   :  { %v610_v43 = vpop.permute.xlu1 %609 }
 0xa1b   :  { %v612_v44 = vadd.f32 %v610_v43, %v602_v42 }
 0xa1d   :  { %3105 = vtanh.f32 %v612_v44 }
 0xa27   :  { %v3106_v24 = vpop.eup %3105 }
 0xa28   :  { %615 = vrot.lane.b32.xlu0 %v3106_v24, %s3206_s4 }
 0xa9a   :  { %v616_v45 = vpop.permute.xlu0 %615 }
 0xa9b   :  { %v618_v46 = vmul.f32 %v3104_v39, %v616_v45 }
 0xa9d   :  { %620 = vrot.lane.b32.xlu1 %v618_v46, %s3207_s23 }
 0xb0f   :  { %v621_v47 = vpop.permute.xlu1 %620 }
 0xb10   :  { %624 = vst.msk [vmem:[#allocation3 + $0x18] sm:$0xff] %vm206_vm2, %v621_v47  ;;  %2741 = vmatmul.mubr.msk.f32.vlgmr.msra.gmra.mrb[12].mxu0 %vm206_vm2, %v621_v47 }
 0xb11   :  { %2980 = vmatpush3.bf16.msra.mxu0 %v3302_v8  ;;  %2762 = vmatprep.mubr.msk.f32.mxu0 %vm3204_vm1, %v3205_v4 }
 0xb12   :  { %2981 = vmatprep.subr.bf16.mxu0 %v3203_v3 }
 0xb15   :  { %2983 = vmatpush3.bf16.msra.mxu0 %v3320_v13 }
 0xb17   :  { %v1048_v29 = vld [vmem:[#allocation3 + $0x18] sm:$0xff] }
 0xbe3   :  { %v695_v48 = vpop.f32.mrb[12].mxu0 }
 0xbe4   :  { %v699_v49 = vadd.f32 %v695_v48, %v3367_v30  ;;  %v2742_v50 = vpop.f32.mrb[13].mxu0 }
 0xbe6   :  { %3107 = vtanh.f32 %v699_v49  ;;  %v2480_v52 = vmul.f32 -1.442695, %v699_v49 }
 0xbe8   :  { %3109 = vpow2.f32 %v2480_v52 }
 0xbf0   :  { %v3108_v51 = vpop.eup %3107 }
 0xbf1   :  { %709 = vrot.lane.b32.xlu0 %v3108_v51, %s3206_s4 }
 0xbf2   :  { %v3110_v53 = vpop.eup %3109 }
 0xbf3   :  { %v703_v54 = vadd.f32 1.0, %v3110_v53  ;;  %v1201_v53 = vld [vmem:[%s3816_s6] sm:$0xff] }
 0xbf5   :  { %3111 = vrcp.f32 %v703_v54  ;;  %v1202_v54 = vld [vmem:[%s3816_s6 + $0x8] sm:$0xff] }
 0xbff   :  { %v3112_v55 = vpop.eup %3111 }
 0xc00   :  { %v707_v58 = vmul.f32 %v3112_v55, %v612_v44 }
 0xc63   :  { %v710_v56 = vpop.permute.xlu0 %709 }
 0xc64   :  { %v712_v57 = vmul.f32 %v3112_v55, %v710_v56  ;;  %v1203_v56 = vld [vmem:[%s3816_s6 + $0x10] sm:$0xff] }
 0xc66   :  { %714 = vrot.lane.b32.xlu1 %v712_v57, %s3207_s23  ;;  %v1204_v57 = vld [vmem:[%s3816_s6 + $0x18] sm:$0xff] }
 0xcd8   :  { %v715_v59 = vpop.permute.xlu1 %714 }
 0xcd9   :  { %v717_v60 = vadd.f32 %v715_v59, %v707_v58  ;;  %v3494_v58 = vpack.c.bf16 %v1204_v57, %v1203_v56 }
 0xcdb   :  { %3113 = vtanh.f32 %v717_v60 }
 0xce5   :  { %v3114_v30 = vpop.eup %3113 }
 0xce6   :  { %720 = vrot.lane.b32.xlu0 %v3114_v30, %s3206_s4 }
 0xd58   :  { %v721_v61 = vpop.permute.xlu0 %720 }
 0xd59   :  { %v723_v62 = vmul.f32 %v3112_v55, %v721_v61  ;;  %v3484_v55 = vpack.c.bf16 %v1202_v54, %v1201_v53 }
 0xd5b   :  { %725 = vrot.lane.b32.xlu1 %v723_v62, %s3207_s23 }
 0xdcd   :  { %v726_v63 = vpop.permute.xlu1 %725 }
 0xdce   :  { %729 = vst.msk [vmem:[#allocation3 + $0x20] sm:$0xff] %vm206_vm2, %v726_v63  ;;  %2752 = vmatmul.mubr.msk.f32.vlgmr.msra.gmra.mrb[4].mxu1 %vm206_vm2, %v726_v63 }
 0xdcf   :  { %2986 = vmatpush3.bf16.msra.mxu1 %v3302_v8  ;;  %2773 = vmatprep.mubr.msk.f32.mxu1 %vm3204_vm1, %v3205_v4 }
 0xdd0   :  { %2987 = vmatprep.subr.bf16.mxu1 %v3203_v3 }
 0xdd3   :  { %2989 = vmatpush3.bf16.msra.mxu1 %v3320_v13 }
 0xdd4   :  { %2998 = vmatprep.subr.bf16.mxu1 %v3203_v3 }
 0xdd5   :  { %v1049_v31 = vld [vmem:[#allocation3 + $0x20] sm:$0xff] }
 0xea1   :  { %v800_v0 = vpop.f32.mrb[4].mxu1 }
 0xea2   :  { %v804_v1 = vadd.f32 %v800_v0, %v3365_v28  ;;  %v2753_v2 = vpop.f32.mrb[5].mxu1  ;;  %v1053_v28 = vld [vmem:[%s3815_s5] sm:$0xff] }
 0xea3   :  { %v2990_v16 = vpack.c.bf16 %v1054_v15, %v1053_v28 }
 0xea4   :  { %3115 = vtanh.f32 %v804_v1  ;;  %v2482_v6 = vmul.f32 -1.442695, %v804_v1  ;;  %v3519_v1 = vld [vmem:[%s3817_s7] ss:$0 sm:$0xff] }
 0xea5   :  { %2991 = vmatprep.subr.bf16.mxu0 %v2990_v16 }
 0xea6   :  { %3117 = vpow2.f32 %v2482_v6 }
 0xeae   :  { %v3116_v5 = vpop.eup %3115 }
 0xeaf   :  { %814 = vrot.lane.b32.xlu0 %v3116_v5, %s3206_s4 }
 0xeb0   :  { %v3118_v8 = vpop.eup %3117 }
 0xeb1   :  { %v808_v7 = vadd.f32 1.0, %v3118_v8 }
 0xeb3   :  { %3119 = vrcp.f32 %v808_v7 }
 0xebd   :  { %v3120_v9 = vpop.eup %3119 }
 0xebe   :  { %v812_v13 = vmul.f32 %v3120_v9, %v717_v60 }
 0xf21   :  { %v815_v10 = vpop.permute.xlu0 %814 }
 0xf22   :  { %v817_v11 = vmul.f32 %v3120_v9, %v815_v10 }
 0xf24   :  { %819 = vrot.lane.b32.xlu1 %v817_v11, %s3207_s23 }
 0xf96   :  { %v820_v12 = vpop.permute.xlu1 %819 }
 0xf97   :  { %v822_v14 = vadd.f32 %v820_v12, %v812_v13 }
 0xf99   :  { %3121 = vtanh.f32 %v822_v14 }
 0xfa3   :  { %v3122_v17 = vpop.eup %3121 }
 0xfa4   :  { %825 = vrot.lane.b32.xlu0 %v3122_v17, %s3206_s4 }
0x1016   :  { %v826_v18 = vpop.permute.xlu0 %825 }
0x1017   :  { %v828_v19 = vmul.f32 %v3120_v9, %v826_v18 }
0x1019   :  { %830 = vrot.lane.b32.xlu1 %v828_v19, %s3207_s23 }
0x108b   :  { %v831_v23 = vpop.permute.xlu1 %830 }
0x108c   :  { %834 = vst.msk [vmem:[#allocation3 + $0x28] sm:$0xff] %vm206_vm2, %v831_v23  ;;  %2763 = vmatmul.mubr.msk.f32.vlgmr.msra.gmra.mrb[14].mxu0 %vm206_vm2, %v831_v23 }
0x108d   :  { %2993 = vmatpush3.bf16.msra.mxu0 %v2990_v16  ;;  %2784 = vmatprep.mubr.msk.f32.mxu0 %vm206_vm2, %v1045_v25 }
0x108e   :  { %2995 = vmatprep.subr.bf16.mxu0 %v2994_v22 }
0x1091   :  { %2997 = vmatpush3.bf16.msra.mxu0 %v2994_v22 }
0x1092   :  { %3010 = vmatprep.subr.bf16.mxu0 %v3203_v3 }
0x1093   :  { %v1050_v33 = vld [vmem:[#allocation3 + $0x28] sm:$0xff] }
0x1094   :  { %2785 = vmatmul.mubr.msk.f32.vlgmr.msra.gmra.mrb[16].mxu0 %vm206_vm2, %v1046_v26 }
0x1095   :  { %2787 = vmatprep.mubr.msk.f32.mxu0 %vm206_vm2, %v1047_v27  ;;  %3012 = vmatpush3.bf16.msra.mxu0 %v3484_v55 }
0x1096   :  { %3013 = vmatprep.subr.bf16.mxu0 %v3203_v3 }
0x1098   :  { %2788 = vmatmul.mubr.msk.f32.gmra.mrb[18].mxu0 %vm206_vm2, %v1048_v29 }
0x1099   :  { %2790 = vmatprep.mubr.msk.f32.mxu0 %vm206_vm2, %v1049_v31  ;;  %3015 = vmatpush3.bf16.msra.mxu0 %v3494_v58 }
0x109a   :  { %3022 = vmatprep.subr.bf16.mxu0 %v3203_v3 }
0x109c   :  { %2791 = vmatmul.mubr.msk.f32.gmra.mrb[20].mxu0 %vm206_vm2, %v1050_v33 }
0x115f   :  { %v905_v35 = vpop.f32.mrb[14].mxu0 }
0x1160   :  { %v909_v36 = vadd.f32 %v905_v35, %v3371_v34  ;;  %v2764_v37 = vpop.f32.mrb[15].mxu0 }
0x1162   :  { %3123 = vtanh.f32 %v909_v36  ;;  %v2484_v24 = vmul.f32 -1.442695, %v909_v36 }
0x1164   :  { %3125 = vpow2.f32 %v2484_v24 }
0x1167   :  { %v3462_v38 = vpop.f32.mrb[16].mxu0 }
0x1168   :  { %v1154_v39 = vpop.f32.mrb[17].mxu0 }
0x1169   :  { %v1155_v2 = vadd.f32 %v3519_v1, %v1154_v39  ;;  %v1160_v39 = vadd.f32 %v3462_v38, %v3519_v1 }
0x116b   :  { %v3464_v40 = vpop.f32.mrb[18].mxu0 }
0x116c   :  { %v3124_v41 = vpop.eup %3123  ;;  %v3466_v42 = vpop.f32.mrb[19].mxu0 }
0x116d   :  { %919 = vrot.lane.b32.xlu0 %v3124_v41, %s3206_s4 }
0x116e   :  { %v3126_v45 = vpop.eup %3125 }
0x116f   :  { %v3469_v43 = vpop.f32.mrb[20].mxu0  ;;  %v913_v34 = vadd.f32 1.0, %v3126_v45 }
0x1170   :  { %v3471_v44 = vpop.f32.mrb[21].mxu0 }
0x1171   :  { %3127 = vrcp.f32 %v913_v34 }
0x117b   :  { %v3128_v46 = vpop.eup %3127 }
0x117c   :  { %v917_v49 = vmul.f32 %v3128_v46, %v822_v14 }
0x11df   :  { %v920_v47 = vpop.permute.xlu0 %919 }
0x11e0   :  { %v922_v48 = vmul.f32 %v3128_v46, %v920_v47 }
0x11e2   :  { %924 = vrot.lane.b32.xlu1 %v922_v48, %s3207_s23 }
0x1254   :  { %v925_v50 = vpop.permute.xlu1 %924 }
0x1255   :  { %v3474_v51 = vadd.f32 %v925_v50, %v917_v49 }
0x1257   :  { %3129 = vtanh.f32 %v3474_v51 }
0x1261   :  { %v3130_v52 = vpop.eup %3129 }
0x1262   :  { %930 = vrot.lane.b32.xlu0 %v3130_v52, %s3206_s4 }
0x12d4   :  { %v931_v59 = vpop.permute.xlu0 %930 }
0x12d5   :  { %v933_v60 = vmul.f32 %v3128_v46, %v931_v59 }
0x12d7   :  { %935 = vrot.lane.b32.xlu1 %v933_v60, %s3207_s23 }
0x1349   :  { %v936_v30 = vpop.permute.xlu1 %935 }
0x134a   :  { %939 = vst.msk [vmem:[#allocation3 + $0x30] sm:$0xff] %vm206_vm2, %v936_v30  ;;  %2774 = vmatmul.mubr.msk.f32.vlgmr.msra.gmra.mrb[6].mxu1 %vm206_vm2, %v936_v30 }
0x134b   :  { %3000 = vmatpush3.bf16.msra.mxu1 %v3484_v55  ;;  %2804 = vmatprep.mubr.msk.f32.mxu1 %vm3204_vm1, %v3205_v4 }
0x134c   :  { %3001 = vmatprep.subr.bf16.mxu1 %v3203_v3 }
0x134f   :  { %3003 = vmatpush3.bf16.msra.mxu1 %v3494_v58 }
0x1350   :  { %3004 = vmatprep.subr.bf16.mxu1 %v3203_v3 }
0x1351   :  { %v1051_v61 = vld [vmem:[#allocation3 + $0x30] sm:$0xff] }
0x1352   :  { %2805 = vmatmul.mubr.f32.vlgmr.msra.gmra.mrb[8].mxu1 %v3205_v4  ;;  %2793 = vmatprep.mubr.msk.f32.mxu0 %vm206_vm2, %v1051_v61 }
0x1353   :  { %3006 = vmatpush3.bf16.msra.mxu1 %v3484_v55  ;;  %2815 = vmatprep.mubr.msk.f32.mxu1 %vm3204_vm1, %v3205_v4 }
0x1354   :  { %3007 = vmatprep.subr.bf16.mxu1 %v3203_v3 }
0x1357   :  { %3009 = vmatpush3.bf16.msra.mxu1 %v3494_v58 }
0x1358   :  { %3016 = vmatprep.subr.bf16.mxu1 %v3203_v3 }
0x141d   :  { %v1010_v62 = vpop.f32.mrb[6].mxu1 }
0x141e   :  { %v1014_v63 = vadd.f32 %v1010_v62, %v3369_v32  ;;  %v2775_v0 = vpop.f32.mrb[7].mxu1 }
0x1420   :  { %v2486_v18 = vmul.f32 -1.442695, %v1014_v63 }
0x1425   :  { %v1272_v5 = vpop.f32.mrb[8].mxu1 }
0x1426   :  { %v1276_v6 = vadd.f32 %v1272_v5, %v1155_v2  ;;  %v2806_v8 = vpop.f32.mrb[9].mxu1 }
0x1428   :  { %3131 = vtanh.f32 %v1276_v6  ;;  %v2496_v9 = vmul.f32 -1.442695, %v1276_v6 }
0x142a   :  { %3133 = vpow2.f32 %v2496_v9 }
0x1432   :  { %v3132_v7 = vpop.eup %3131 }
0x1433   :  { %1286 = vrot.lane.b32.xlu0 %v3132_v7, %s3206_s4 }
0x1434   :  { %v3134_v10 = vpop.eup %3133 }
0x1435   :  { %v1280_v11 = vadd.f32 1.0, %v3134_v10 }
0x1437   :  { %3135 = vrcp.f32 %v1280_v11 }
0x1441   :  { %v3136_v32 = vpop.eup %3135 }
0x1442   :  { %v1284_v14 = vmul.f32 0.0, %v3136_v32 }
0x14a5   :  { %v1287_v13 = vpop.permute.xlu0 %1286 }
0x14a6   :  { %v1289_v12 = vmul.f32 %v3136_v32, %v1287_v13 }
0x14a8   :  { %1291 = vrot.lane.b32.xlu1 %v1289_v12, %s3207_s23 }
0x151a   :  { %v1292_v28 = vpop.permute.xlu1 %1291 }
0x151b   :  { %v1294_v15 = vadd.f32 %v1292_v28, %v1284_v14 }
0x151d   :  { %3137 = vtanh.f32 %v1294_v15 }
0x151e   :  { %3139 = vtanh.f32 %v1014_v63  ;;  %v1165_v63 = vadd.f32 %v3519_v1, %v3466_v42 }
0x151f   :  { %3141 = vpow2.f32 %v2486_v18 }
0x1527   :  { %v3138_v16 = vpop.eup %3137 }
0x1528   :  { %1297 = vrot.lane.b32.xlu0 %v3138_v16, %s3206_s4  ;;  %v3140_v17 = vpop.eup %3139 }
0x1529   :  { %v3142_v19 = vpop.eup %3141 }
0x152a   :  { %v1018_v20 = vadd.f32 1.0, %v3142_v19 }
0x152c   :  { %1024 = vrot.lane.b32.xlu0 %v3140_v17, %s3206_s4  ;;  %3143 = vrcp.f32 %v1018_v20  ;;  %v1170_v17 = vadd.f32 %v3464_v40, %v3519_v1 }
0x1536   :  { %v3144_v23 = vpop.eup %3143 }
0x1537   :  { %v1022_v29 = vmul.f32 %v3144_v23, %v3474_v51 }
0x159a   :  { %v1298_v21 = vpop.permute.xlu0 %1297 }
0x159b   :  { %v1300_v22 = vmul.f32 %v3136_v32, %v1298_v21 }
0x159d   :  { %1302 = vrot.lane.b32.xlu1 %v1300_v22, %s3207_s23 }
0x159e   :  { %v1025_v25 = vpop.permute.xlu0 %1024 }
0x159f   :  { %v1027_v26 = vmul.f32 %v3144_v23, %v1025_v25 }
0x15a1   :  { %1029 = vrot.lane.b32.xlu0 %v1027_v26, %s3207_s23 }
0x160f   :  { %v1303_v27 = vpop.permute.xlu1 %1302 }
0x1610   :  { %1305 = vst.msk [vmem:[#allocation3] sm:$0xff] %vm206_vm2, %v1303_v27  ;;  %2816 = vmatmul.mubr.msk.f32.vlgmr.msra.gmra.mrb[10].mxu1 %vm206_vm2, %v1303_v27 }
0x1611   :  { %3018 = vmatpush3.bf16.msra.mxu1 %v3484_v55  ;;  %2837 = vmatprep.mubr.msk.f32.mxu1 %vm3204_vm1, %v3205_v4 }
0x1612   :  { %3019 = vmatprep.subr.bf16.mxu1 %v3203_v3 }
0x1613   :  { %v1030_v31 = vpop.permute.xlu0 %1029 }
0x1614   :  { %v1032_v33 = vadd.f32 %v1030_v31, %v1022_v29 }
0x1615   :  { %3021 = vmatpush3.bf16.msra.mxu1 %v3494_v58 }
0x1616   :  { %3145 = vtanh.f32 %v1032_v33  ;;  %3028 = vmatprep.subr.bf16.mxu1 %v3203_v3 }
0x1620   :  { %v3146_v35 = vpop.eup %3145 }
0x1621   :  { %1035 = vrot.lane.b32.xlu0 %v3146_v35, %s3206_s4 }
0x1693   :  { %v1036_v36 = vpop.permute.xlu0 %1035 }
0x1694   :  { %v1038_v37 = vmul.f32 %v3144_v23, %v1036_v36 }
0x1696   :  { %1040 = vrot.lane.b32.xlu0 %v1038_v37, %s3207_s23 }
0x16e3   :  { %v1375_v41 = vpop.f32.mrb[10].mxu1 }
0x16e4   :  { %v1379_v24 = vadd.f32 %v1375_v41, %v1160_v39  ;;  %v2817_v45 = vpop.f32.mrb[11].mxu1  ;;  %v1175_v41 = vadd.f32 %v3519_v1, %v3471_v44 }
0x16e6   :  { %3147 = vtanh.f32 %v1379_v24  ;;  %v2498_v48 = vmul.f32 -1.442695, %v1379_v24 }
0x16e8   :  { %3149 = vpow2.f32 %v2498_v48 }
0x16f0   :  { %v3148_v34 = vpop.eup %3147 }
0x16f1   :  { %1389 = vrot.lane.b32.xlu1 %v3148_v34, %s3206_s4 }
0x16f2   :  { %v3150_v49 = vpop.eup %3149 }
0x16f3   :  { %v1383_v38 = vadd.f32 1.0, %v3150_v49 }
0x16f5   :  { %3151 = vrcp.f32 %v1383_v38 }
0x16ff   :  { %v3152_v50 = vpop.eup %3151 }
0x1700   :  { %v1387_v53 = vmul.f32 %v3152_v50, %v1294_v15 }
0x1708   :  { %v1041_v46 = vpop.permute.xlu0 %1040 }
0x1709   :  { %1044 = vst.msk [vmem:[#allocation3 + $0x38] sm:$0xff] %vm206_vm2, %v1041_v46 }
0x1710   :  { %v1052_v47 = vld [vmem:[#allocation3 + $0x38] sm:$0xff] }
0x1711   :  { %2794 = vmatmul.mubr.msk.f32.gmra.mrb[22].mxu0 %vm206_vm2, %v1052_v47 }
0x1712   :  { %2826 = vmatprep.mubr.msk.f32.mxu0 %vm3204_vm1, %v3205_v4 }
0x1763   :  { %v1390_v51 = vpop.permute.xlu1 %1389 }
0x1764   :  { %v1392_v52 = vmul.f32 %v3152_v50, %v1390_v51 }
0x1766   :  { %1394 = vrot.lane.b32.xlu1 %v1392_v52, %s3207_s23 }
0x17d8   :  { %v1395_v54 = vpop.permute.xlu1 %1394 }
0x17d9   :  { %v1397_v56 = vadd.f32 %v1395_v54, %v1387_v53 }
0x17db   :  { %3153 = vtanh.f32 %v1397_v56 }
0x17e4   :  { %v3547_v57 = vpop.f32.mrb[22].mxu0 }
0x17e5   :  { %v3154_v59 = vpop.eup %3153  ;;  %v3549_v60 = vpop.f32.mrb[23].mxu0 }
0x17e6   :  { %1400 = vrot.lane.b32.xlu1 %v3154_v59, %s3206_s4 }
0x1858   :  { %v1401_v30 = vpop.permute.xlu1 %1400 }
0x1859   :  { %v1403_v61 = vmul.f32 %v3152_v50, %v1401_v30 }
0x185b   :  { %1405 = vrot.lane.b32.xlu1 %v1403_v61, %s3207_s23  ;;  %v1180_v61 = vadd.f32 %v3469_v43, %v3519_v1 }
0x18cd   :  { %v1406_v62 = vpop.permute.xlu1 %1405 }
0x18ce   :  { %1408 = vst.msk [vmem:[#allocation3 + $0x8] sm:$0xff] %vm206_vm2, %v1406_v62  ;;  %2827 = vmatmul.mubr.msk.f32.vlgmr.msra.gmra.mrb[24].mxu0 %vm206_vm2, %v1406_v62 }
0x18cf   :  { %3024 = vmatpush3.bf16.msra.mxu0 %v3484_v55  ;;  %2848 = vmatprep.mubr.msk.f32.mxu0 %vm3204_vm1, %v3205_v4 }
0x18d0   :  { %3025 = vmatprep.subr.bf16.mxu0 %v3203_v3 }
0x18d3   :  { %3027 = vmatpush3.bf16.msra.mxu0 %v3494_v58 }
0x18d4   :  { %3034 = vmatprep.subr.bf16.mxu0 %v3203_v3 }
0x19a1   :  { %v1478_v0 = vpop.f32.mrb[24].mxu0 }
0x19a2   :  { %v1482_v2 = vadd.f32 %v1478_v0, %v1165_v63  ;;  %v2828_v5 = vpop.f32.mrb[25].mxu0 }
0x19a4   :  { %3155 = vtanh.f32 %v1482_v2  ;;  %v2500_v8 = vmul.f32 -1.442695, %v1482_v2 }
0x19a6   :  { %3157 = vpow2.f32 %v2500_v8 }
0x19ae   :  { %v3156_v6 = vpop.eup %3155 }
0x19af   :  { %1492 = vrot.lane.b32.xlu0 %v3156_v6, %s3206_s4 }
0x19b0   :  { %v3158_v7 = vpop.eup %3157 }
0x19b1   :  { %v1486_v9 = vadd.f32 1.0, %v3158_v7 }
0x19b3   :  { %3159 = vrcp.f32 %v1486_v9  ;;  %v2035_v9 = vld [vmem:[%s3818_s8] sm:$0xff] }
0x19bd   :  { %v3160_v10 = vpop.eup %3159 }
0x19be   :  { %v1490_v13 = vmul.f32 %v3160_v10, %v1397_v56 }
0x1a21   :  { %v1493_v11 = vpop.permute.xlu0 %1492 }
0x1a22   :  { %v1495_v32 = vmul.f32 %v3160_v10, %v1493_v11 }
0x1a24   :  { %1497 = vrot.lane.b32.xlu1 %v1495_v32, %s3207_s23 }
0x1a96   :  { %v1498_v12 = vpop.permute.xlu1 %1497 }
0x1a97   :  { %v1500_v42 = vadd.f32 %v1498_v12, %v1490_v13 }
0x1a99   :  { %3161 = vtanh.f32 %v1500_v42 }
0x1aa3   :  { %v3162_v14 = vpop.eup %3161 }
0x1aa4   :  { %1503 = vrot.lane.b32.xlu0 %v3162_v14, %s3206_s4  ;;  %v2038_v14 = vld [vmem:[%s3818_s8 + $0x18] sm:$0xff] }
0x1b16   :  { %v1504_v28 = vpop.permute.xlu0 %1503 }
0x1b17   :  { %v1506_v15 = vmul.f32 %v3160_v10, %v1504_v28  ;;  %v2036_v10 = vld [vmem:[%s3818_s8 + $0x8] sm:$0xff] }
0x1b18   :  { %v3046_v11 = vpack.c.bf16 %v2036_v10, %v2035_v9  ;;  %v2190_v9 = vld [vmem:[%s3823_s1 + $0x38] sm:$0xff]  ;;  %v1190_v10 = vadd.f32 %v3547_v57, %v3519_v1 }
0x1b19   :  { %1508 = vrot.lane.b32.xlu1 %v1506_v15, %s3207_s23 }
0x1b8b   :  { %v1509_v16 = vpop.permute.xlu1 %1508 }
0x1b8c   :  { %1511 = vst.msk [vmem:[#allocation3 + $0x10] sm:$0xff] %vm206_vm2, %v1509_v16  ;;  %2838 = vmatmul.mubr.msk.f32.vlgmr.msra.gmra.mrb[12].mxu1 %vm206_vm2, %v1509_v16  ;;  %v3624_v16 = vld [vmem:[#allocation3] sm:$0xff] }
0x1b8d   :  { %3030 = vmatpush3.bf16.msra.mxu1 %v3484_v55  ;;  %2859 = vmatprep.mubr.msk.f32.mxu1 %vm3204_vm1, %v3205_v4 }
0x1b8e   :  { %3031 = vmatprep.subr.bf16.mxu1 %v3203_v3 }
0x1b91   :  { %3033 = vmatpush3.bf16.msra.mxu1 %v3494_v58 }
0x1b92   :  { %3040 = vmatprep.subr.bf16.mxu1 %v3203_v3 }
0x1c5f   :  { %v1581_v18 = vpop.f32.mrb[12].mxu1 }
0x1c60   :  { %v1585_v19 = vadd.f32 %v1581_v18, %v1170_v17  ;;  %v2839_v20 = vpop.f32.mrb[13].mxu1  ;;  %v3628_v17 = vld [vmem:[#allocation3 + $0x8] sm:$0xff]  ;;  %v3632_v18 = vld [vmem:[#allocation3 + $0x10] sm:$0xff] }
0x1c62   :  { %3163 = vtanh.f32 %v1585_v19  ;;  %v2502_v22 = vmul.f32 -1.442695, %v1585_v19 }
0x1c64   :  { %3165 = vpow2.f32 %v2502_v22  ;;  %v1185_v22 = vadd.f32 %v3519_v1, %v3549_v60 }
0x1c6c   :  { %v3164_v21 = vpop.eup %3163 }
0x1c6d   :  { %1595 = vrot.lane.b32.xlu0 %v3164_v21, %s3206_s4 }
0x1c6e   :  { %v3166_v23 = vpop.eup %3165 }
0x1c6f   :  { %v1589_v25 = vadd.f32 1.0, %v3166_v23 }
0x1c71   :  { %3167 = vrcp.f32 %v1589_v25 }
0x1c7b   :  { %v3168_v26 = vpop.eup %3167 }
0x1c7c   :  { %v1593_v31 = vmul.f32 %v3168_v26, %v1500_v42  ;;  %v2037_v42 = vld [vmem:[%s3818_s8 + $0x10] sm:$0xff] }
0x1c7d   :  { %v3050_v28 = vpack.c.bf16 %v2038_v14, %v2037_v42  ;;  %v2536_v42 = vld [vmem:[%s3824_s12] ss:$0 sm:$0xff] }
0x1cdf   :  { %v1596_v27 = vpop.permute.xlu0 %1595 }
0x1ce0   :  { %v1598_v29 = vmul.f32 %v3168_v26, %v1596_v27  ;;  %v3653_v27 = vld [vmem:[%s3819_s9] ss:$0 sm:$0xff] }
0x1ce2   :  { %1600 = vrot.lane.b32.xlu1 %v1598_v29, %s3207_s23 }
0x1d54   :  { %v1601_v33 = vpop.permute.xlu1 %1600 }
0x1d55   :  { %v1603_v40 = vadd.f32 %v1601_v33, %v1593_v31 }
0x1d57   :  { %3169 = vtanh.f32 %v1603_v40 }
0x1d61   :  { %v3170_v35 = vpop.eup %3169 }
0x1d62   :  { %1606 = vrot.lane.b32.xlu0 %v3170_v35, %s3206_s4 }
0x1dd4   :  { %v1607_v36 = vpop.permute.xlu0 %1606 }
0x1dd5   :  { %v1609_v37 = vmul.f32 %v3168_v26, %v1607_v36 }
0x1dd7   :  { %1611 = vrot.lane.b32.xlu1 %v1609_v37, %s3207_s23 }
0x1e49   :  { %v1612_v39 = vpop.permute.xlu1 %1611 }
0x1e4a   :  { %1614 = vst.msk [vmem:[#allocation3 + $0x18] sm:$0xff] %vm206_vm2, %v1612_v39  ;;  %2849 = vmatmul.mubr.msk.f32.vlgmr.msra.gmra.mrb[26].mxu0 %vm206_vm2, %v1612_v39 }
0x1e4b   :  { %3036 = vmatpush3.bf16.msra.mxu0 %v3484_v55  ;;  %2870 = vmatprep.mubr.msk.f32.mxu0 %vm3204_vm1, %v3205_v4 }
0x1e4c   :  { %3037 = vmatprep.subr.bf16.mxu0 %v3203_v3 }
0x1e4f   :  { %3039 = vmatpush3.bf16.msra.mxu0 %v3494_v58 }
0x1e50   :  { %3047 = vmatprep.subr.bf16.mxu0 %v3046_v11 }
0x1e51   :  { %v3636_v19 = vld [vmem:[#allocation3 + $0x18] sm:$0xff] }
0x1f1d   :  { %v1684_v24 = vpop.f32.mrb[26].mxu0 }
0x1f1e   :  { %v1688_v45 = vadd.f32 %v1684_v24, %v1175_v41  ;;  %v2850_v34 = vpop.f32.mrb[27].mxu0 }
0x1f20   :  { %3171 = vtanh.f32 %v1688_v45  ;;  %v2504_v47 = vmul.f32 -1.442695, %v1688_v45 }
0x1f22   :  { %3173 = vpow2.f32 %v2504_v47 }
0x1f2a   :  { %v3172_v46 = vpop.eup %3171 }
0x1f2b   :  { %1698 = vrot.lane.b32.xlu0 %v3172_v46, %s3206_s4 }
0x1f2c   :  { %v3174_v48 = vpop.eup %3173 }
0x1f2d   :  { %v1692_v49 = vadd.f32 1.0, %v3174_v48 }
0x1f2f   :  { %3175 = vrcp.f32 %v1692_v49 }
0x1f39   :  { %v3176_v38 = vpop.eup %3175 }
0x1f3a   :  { %v1696_v52 = vmul.f32 %v3176_v38, %v1603_v40 }
0x1f9d   :  { %v1699_v50 = vpop.permute.xlu0 %1698 }
0x1f9e   :  { %v1701_v51 = vmul.f32 %v3176_v38, %v1699_v50 }
0x1fa0   :  { %1703 = vrot.lane.b32.xlu1 %v1701_v51, %s3207_s23 }
0x2012   :  { %v1704_v53 = vpop.permute.xlu1 %1703 }
0x2013   :  { %v1706_v44 = vadd.f32 %v1704_v53, %v1696_v52 }
0x2015   :  { %3177 = vtanh.f32 %v1706_v44 }
0x201f   :  { %v3178_v54 = vpop.eup %3177 }
0x2020   :  { %1709 = vrot.lane.b32.xlu0 %v3178_v54, %s3206_s4  ;;  %v2195_v54 = vld [vmem:[%s3821_s11] sm:$0xff] }
0x2092   :  { %v1710_v56 = vpop.permute.xlu0 %1709 }
0x2093   :  { %v1712_v59 = vmul.f32 %v3176_v38, %v1710_v56 }
0x2095   :  { %1714 = vrot.lane.b32.xlu1 %v1712_v59, %s3207_s23 }
0x2107   :  { %v1715_v30 = vpop.permute.xlu1 %1714 }
0x2108   :  { %1717 = vst.msk [vmem:[#allocation3 + $0x20] sm:$0xff] %vm206_vm2, %v1715_v30  ;;  %2860 = vmatmul.mubr.msk.f32.vlgmr.msra.gmra.mrb[14].mxu1 %vm206_vm2, %v1715_v30  ;;  %v2191_v30 = vld [vmem:[%s3822_s10] sm:$0xff] }
0x2109   :  { %3042 = vmatpush3.bf16.msra.mxu1 %v3484_v55  ;;  %2881 = vmatprep.mubr.msk.f32.mxu1 %vm3204_vm1, %v3205_v4 }
0x210a   :  { %3043 = vmatprep.subr.bf16.mxu1 %v3203_v3 }
0x210d   :  { %3045 = vmatpush3.bf16.msra.mxu1 %v3494_v58 }
0x210e   :  { %2904 = vmatprep.subr.mxu1 %v2195_v54 }
0x210f   :  { %v3640_v20 = vld [vmem:[#allocation3 + $0x20] sm:$0xff] }
0x21db   :  { %v1787_v62 = vpop.f32.mrb[14].mxu1 }
0x21dc   :  { %v1791_v63 = vadd.f32 %v1787_v62, %v1180_v61  ;;  %v2861_v0 = vpop.f32.mrb[15].mxu1  ;;  %v2192_v61 = vld [vmem:[%s3822_s10 + $0x8] sm:$0xff]  ;;  %v2183_v62 = vld [vmem:[%s3823_s1] sm:$0xff] }
0x21de   :  { %3179 = vtanh.f32 %v1791_v63  ;;  %v2506_v5 = vmul.f32 -1.442695, %v1791_v63  ;;  %v3054_v63 = vpack.c.bf16 %v2192_v61, %v2191_v30 }
0x21e0   :  { %3181 = vpow2.f32 %v2506_v5  ;;  %v2194_v5 = vld [vmem:[%s3822_s10 + $0x18] sm:$0xff] }
0x21e8   :  { %v3180_v2 = vpop.eup %3179 }
0x21e9   :  { %1801 = vrot.lane.b32.xlu0 %v3180_v2, %s3206_s4  ;;  %v2193_v2 = vld [vmem:[%s3822_s10 + $0x10] sm:$0xff] }
0x21ea   :  { %v3182_v55 = vpop.eup %3181 }
0x21eb   :  { %v1795_v6 = vadd.f32 1.0, %v3182_v55  ;;  %v2184_v55 = vld [vmem:[%s3823_s1 + $0x8] sm:$0xff] }
0x21ed   :  { %3183 = vrcp.f32 %v1795_v6  ;;  %v2185_v6 = vld [vmem:[%s3823_s1 + $0x10] sm:$0xff] }
0x21f7   :  { %v3184_v4 = vpop.eup %3183 }
0x21f8   :  { %v1799_v58 = vmul.f32 %v3184_v4, %v1706_v44 }
0x225b   :  { %v1802_v8 = vpop.permute.xlu0 %1801 }
0x225c   :  { %v1804_v3 = vmul.f32 %v3184_v4, %v1802_v8  ;;  %v2186_v8 = vld [vmem:[%s3823_s1 + $0x18] sm:$0xff] }
0x225e   :  { %1806 = vrot.lane.b32.xlu1 %v1804_v3, %s3207_s23  ;;  %v2187_v3 = vld [vmem:[%s3823_s1 + $0x20] sm:$0xff] }
0x22d0   :  { %v1807_v7 = vpop.permute.xlu1 %1806 }
0x22d1   :  { %v3605_v43 = vadd.f32 %v1807_v7, %v1799_v58  ;;  %v2188_v7 = vld [vmem:[%s3823_s1 + $0x28] sm:$0xff] }
0x22d3   :  { %3185 = vtanh.f32 %v3605_v43 }
0x22dd   :  { %v3186_v32 = vpop.eup %3185 }
0x22de   :  { %1812 = vrot.lane.b32.xlu0 %v3186_v32, %s3206_s4 }
0x2350   :  { %v1813_v13 = vpop.permute.xlu0 %1812 }
0x2351   :  { %v1815_v12 = vmul.f32 %v3184_v4, %v1813_v13  ;;  %v3058_v4 = vpack.c.bf16 %v2194_v5, %v2193_v2 }
0x2353   :  { %1817 = vrot.lane.b32.xlu1 %v1815_v12, %s3207_s23 }
0x23c5   :  { %v1818_v15 = vpop.permute.xlu1 %1817 }
0x23c6   :  { %1820 = vst.msk [vmem:[#allocation3 + $0x28] sm:$0xff] %vm206_vm2, %v1818_v15  ;;  %2871 = vmatmul.mubr.msk.f32.vlgmr.msra.gmra.mrb[28].mxu0 %vm206_vm2, %v1818_v15 }
0x23c7   :  { %3049 = vmatpush3.bf16.msra.mxu0 %v3046_v11  ;;  %2892 = vmatprep.mubr.msk.f32.mxu0 %vm206_vm2, %v3624_v16 }
0x23c8   :  { %3051 = vmatprep.subr.bf16.mxu0 %v3050_v28 }
0x23cb   :  { %3053 = vmatpush3.bf16.msra.mxu0 %v3050_v28 }
0x23cd   :  { %v3644_v21 = vld [vmem:[#allocation3 + $0x28] sm:$0xff] }
0x23ce   :  { %2893 = vmatmul.mubr.msk.f32.vlgmr.msra.gmra.mrb[30].mxu0 %vm206_vm2, %v3628_v17 }
0x23cf   :  { %2895 = vmatprep.mubr.msk.f32.mxu0 %vm206_vm2, %v3632_v18 }
0x23d2   :  { %2896 = vmatmul.mubr.msk.f32.gmra.mrb[32].mxu0 %vm206_vm2, %v3636_v19 }
0x23d3   :  { %2898 = vmatprep.mubr.msk.f32.mxu0 %vm206_vm2, %v3640_v20 }
0x23d6   :  { %2899 = vmatmul.mubr.msk.f32.gmra.mrb[34].mxu0 %vm206_vm2, %v3644_v21 }
0x2499   :  { %v1890_v23 = vpop.f32.mrb[28].mxu0 }
0x249a   :  { %v1894_v25 = vadd.f32 %v1890_v23, %v1185_v22  ;;  %v2872_v26 = vpop.f32.mrb[29].mxu0 }
0x249c   :  { %3187 = vtanh.f32 %v1894_v25  ;;  %v2508_v46 = vmul.f32 -1.442695, %v1894_v25 }
0x249e   :  { %3189 = vpow2.f32 %v2508_v46 }
0x24a1   :  { %v2894_v29 = vpop.f32.mrb[30].mxu0 }
0x24a2   :  { %v2142_v31 = vadd.f32 %v2894_v29, %v3653_v27  ;;  %v2136_v33 = vpop.f32.mrb[31].mxu0 }
0x24a3   :  { %v2137_v40 = vadd.f32 %v3653_v27, %v2136_v33 }
0x24a4   :  { %2176 = vst.msk [vmem:[%s3820_s13 + $0x8] sm:$0xff] %vm63_vm0, %v2142_v31 }
0x24a5   :  { %2175 = vst.msk [vmem:[%s3820_s13] sm:$0xff] %vm63_vm0, %v2137_v40  ;;  %v2897_v60 = vpop.f32.mrb[32].mxu0 }
0x24a6   :  { %v3188_v35 = vpop.eup %3187  ;;  %v2152_v36 = vadd.f32 %v2897_v60, %v3653_v27  ;;  %v2146_v37 = vpop.f32.mrb[33].mxu0 }
0x24a7   :  { %v2147_v39 = vadd.f32 %v3653_v27, %v2146_v37  ;;  %1904 = vrot.lane.b32.xlu0 %v3188_v35, %s3206_s4 }
0x24a8   :  { %2178 = vst.msk [vmem:[%s3820_s13 + $0x18] sm:$0xff] %vm63_vm0, %v2152_v36  ;;  %v3190_v47 = vpop.eup %3189 }
0x24a9   :  { %2177 = vst.msk [vmem:[%s3820_s13 + $0x10] sm:$0xff] %vm63_vm0, %v2147_v39  ;;  %v2900_v41 = vpop.f32.mrb[34].mxu0  ;;  %v1898_v48 = vadd.f32 1.0, %v3190_v47 }
0x24aa   :  { %v2162_v24 = vadd.f32 %v2900_v41, %v3653_v27  ;;  %v2156_v45 = vpop.f32.mrb[35].mxu0 }
0x24ab   :  { %v2157_v34 = vadd.f32 %v3653_v27, %v2156_v45  ;;  %3191 = vrcp.f32 %v1898_v48 }
0x24ac   :  { %2180 = vst.msk [vmem:[%s3820_s13 + $0x28] sm:$0xff] %vm63_vm0, %v2162_v24 }
0x24ad   :  { %2179 = vst.msk [vmem:[%s3820_s13 + $0x20] sm:$0xff] %vm63_vm0, %v2157_v34 }
0x24b5   :  { %v3192_v49 = vpop.eup %3191 }
0x24b6   :  { %v1902_v51 = vmul.f32 %v3192_v49, %v3605_v43  ;;  %v2189_v43 = vld [vmem:[%s3823_s1 + $0x30] sm:$0xff] }
0x2519   :  { %v1905_v38 = vpop.permute.xlu0 %1904 }
0x251a   :  { %v1907_v50 = vmul.f32 %v3192_v49, %v1905_v38 }
0x251c   :  { %1909 = vrot.lane.b32.xlu1 %v1907_v50, %s3207_s23 }
0x258e   :  { %v1910_v52 = vpop.permute.xlu1 %1909 }
0x258f   :  { %v3688_v53 = vadd.f32 %v1910_v52, %v1902_v51 }
0x2591   :  { %3193 = vtanh.f32 %v3688_v53 }
0x259b   :  { %v3194_v44 = vpop.eup %3193 }
0x259c   :  { %1915 = vrot.lane.b32.xlu0 %v3194_v44, %s3206_s4 }
0x260e   :  { %v1916_v56 = vpop.permute.xlu0 %1915 }
0x260f   :  { %v1918_v59 = vmul.f32 %v3192_v49, %v1916_v56 }
0x2611   :  { %1920 = vrot.lane.b32.xlu1 %v1918_v59, %s3207_s23 }
0x2683   :  { %v1921_v0 = vpop.permute.xlu1 %1920 }
0x2684   :  { %1923 = vst.msk [vmem:[#allocation3 + $0x30] sm:$0xff] %vm206_vm2, %v1921_v0  ;;  %2882 = vmatmul.mubr.msk.f32.vlgmr.msra.gmra.mrb[16].mxu1 %vm206_vm2, %v1921_v0 }
0x2685   :  { %2905 = vmatpush3.msra.mxu1 %v2195_v54  ;;  %2906 = vmatprep.mubr.msk.f32.mxu1 %vm2196_vm3, %v2183_v62 }
0x2686   :  { %3055 = vmatprep.subr.bf16.mxu1 %v3054_v63 }
0x2688   :  { %2907 = vmatmul.mubr.msk.f32.vlgmr.msra.gmra.mrb[18].mxu1 %vm2196_vm3, %v2184_v55 }
0x2689   :  { %2909 = vmatprep.mubr.msk.f32.mxu1 %vm2196_vm3, %v2185_v6  ;;  %3057 = vmatpush3.bf16.msra.mxu1 %v3054_v63 }
0x268a   :  { %3059 = vmatprep.subr.bf16.mxu1 %v3058_v4 }
0x268b   :  { %v2033_v58 = vld [vmem:[#allocation3 + $0x30] sm:$0xff] }
0x268c   :  { %2901 = vmatprep.mubr.msk.f32.mxu0 %vm206_vm2, %v2033_v58  ;;  %2910 = vmatmul.mubr.msk.f32.gmra.mrb[20].mxu1 %vm2196_vm3, %v2186_v8 }
0x268d   :  { %2912 = vmatprep.mubr.msk.f32.mxu1 %vm2196_vm3, %v2187_v3  ;;  %3061 = vmatpush3.bf16.msra.mxu1 %v3058_v4 }
0x2690   :  { %2913 = vmatmul.mubr.msk.f32.gmra.mrb[22].mxu1 %vm2196_vm3, %v2188_v7 }
0x2691   :  { %2915 = vmatprep.mubr.msk.f32.mxu1 %vm2196_vm3, %v2189_v43 }
0x2694   :  { %2916 = vmatmul.mubr.msk.f32.gmra.mrb[24].mxu1 %vm2196_vm3, %v2190_v9 }
0x2695   :  { %2926 = vmatprep.mubr.msk.f32.mxu1 %vm206_vm2, %v3624_v16 }
0x2698   :  { %2927 = vmatmul.mubr.msk.f32.vlgmr.msra.gmra.mrb[18].mxu1 %vm206_vm2, %v3628_v17 }
0x2699   :  { %2929 = vmatprep.mubr.msk.f32.mxu1 %vm206_vm2, %v3632_v18 }
0x269c   :  { %2930 = vmatmul.mubr.msk.f32.gmra.mrb[20].mxu1 %vm206_vm2, %v3636_v19 }
0x269d   :  { %2932 = vmatprep.mubr.msk.f32.mxu1 %vm206_vm2, %v3640_v20 }
0x26a0   :  { %2933 = vmatmul.mubr.msk.f32.gmra.mrb[22].mxu1 %vm206_vm2, %v3644_v21 }
0x26a1   :  { %2935 = vmatprep.mubr.msk.f32.mxu1 %vm206_vm2, %v2033_v58 }
0x2757   :  { %v1993_v11 = vpop.f32.mrb[16].mxu1 }
0x2758   :  { %v1997_v32 = vadd.f32 %v1993_v11, %v1190_v10  ;;  %v2883_v13 = vpop.f32.mrb[17].mxu1 }
0x275a   :  { %3195 = vtanh.f32 %v1997_v32  ;;  %v2510_v23 = vmul.f32 -1.442695, %v1997_v32 }
0x275c   :  { %3197 = vpow2.f32 %v2510_v23 }
0x2764   :  { %v3196_v12 = vpop.eup %3195 }
0x2765   :  { %2007 = vrot.lane.b32.xlu0 %v3196_v12, %s3206_s4 }
0x2766   :  { %v3198_v25 = vpop.eup %3197 }
0x2767   :  { %v2001_v26 = vadd.f32 1.0, %v3198_v25 }
0x2769   :  { %3199 = vrcp.f32 %v2001_v26 }
0x276b   :  { %v2928_v14 = vpop.f32.mrb[18].mxu1 }
0x276c   :  { %v2439_v28 = vadd.f32 %v2928_v14, %v2536_v42  ;;  %v2392_v15 = vpop.f32.mrb[19].mxu1 }
0x276d   :  { %v2438_v16 = vadd.f32 %v2536_v42, %v2392_v15 }
0x276e   :  { %2448 = vst.msk [vmem:[%s3825_s14 + $0x8] sm:$0xff] %vm2446_vm4, %v2439_v28 }
0x276f   :  { %2447 = vst.msk [vmem:[%s3825_s14] sm:$0xff] %vm2446_vm4, %v2438_v16  ;;  %v2931_v1 = vpop.f32.mrb[20].mxu1 }
0x2770   :  { %v2441_v57 = vadd.f32 %v2931_v1, %v2536_v42  ;;  %v2402_v17 = vpop.f32.mrb[21].mxu1 }
0x2771   :  { %v2440_v18 = vadd.f32 %v2536_v42, %v2402_v17 }
0x2772   :  { %2450 = vst.msk [vmem:[%s3825_s14 + $0x18] sm:$0xff] %vm2446_vm4, %v2441_v57 }
0x2773   :  { %2449 = vst.msk [vmem:[%s3825_s14 + $0x10] sm:$0xff] %vm2446_vm4, %v2440_v18  ;;  %v2934_v19 = vpop.f32.mrb[22].mxu1  ;;  %v3200_v29 = vpop.eup %3199 }
0x2774   :  { %v2443_v20 = vadd.f32 %v2934_v19, %v2536_v42  ;;  %v2412_v21 = vpop.f32.mrb[23].mxu1  ;;  %v2005_v40 = vmul.f32 %v3200_v29, %v3688_v53 }
0x2775   :  { %v2442_v22 = vadd.f32 %v2536_v42, %v2412_v21 }
0x2776   :  { %2452 = vst.msk [vmem:[%s3825_s14 + $0x28] sm:$0xff] %vm2446_vm4, %v2443_v20 }
0x2777   :  { %2451 = vst.msk [vmem:[%s3825_s14 + $0x20] sm:$0xff] %vm2446_vm4, %v2442_v22 }
0x27d7   :  { %v2008_v31 = vpop.permute.xlu0 %2007 }
0x27d8   :  { %v2010_v33 = vmul.f32 %v3200_v29, %v2008_v31 }
0x27da   :  { %2012 = vrot.lane.b32.xlu1 %v2010_v33, %s3207_s23 }
0x284c   :  { %v2013_v60 = vpop.permute.xlu1 %2012 }
0x284d   :  { %v2015_v35 = vadd.f32 %v2013_v60, %v2005_v40 }
0x284f   :  { %3201 = vtanh.f32 %v2015_v35 }
0x2859   :  { %v3202_v36 = vpop.eup %3201 }
0x285a   :  { %2018 = vrot.lane.b32.xlu0 %v3202_v36, %s3206_s4 }
0x28cc   :  { %v2019_v37 = vpop.permute.xlu0 %2018 }
0x28cd   :  { %v2021_v39 = vmul.f32 %v3200_v29, %v2019_v37 }
0x28cf   :  { %2023 = vrot.lane.b32.xlu1 %v2021_v39, %s3207_s23 }
0x2941   :  { %v2024_v41 = vpop.permute.xlu1 %2023 }
0x2942   :  { %2026 = vst.msk [vmem:[#allocation3 + $0x38] sm:$0xff] %vm206_vm2, %v2024_v41 }
0x2949   :  { %v2034_v24 = vld [vmem:[#allocation3 + $0x38] sm:$0xff] }
0x294a   :  { %2902 = vmatmul.mubr.msk.f32.gmra.mrb[36].mxu0 %vm206_vm2, %v2034_v24  ;;  %2936 = vmatmul.mubr.msk.f32.gmra.mrb[24].mxu1 %vm206_vm2, %v2034_v24 }
0x2a1d   :  { %v2903_v45 = vpop.f32.mrb[36].mxu0  ;;  %v2937_v34 = vpop.f32.mrb[24].mxu1 }
0x2a1e   :  { %v2172_v46 = vadd.f32 %v2903_v45, %v3653_v27  ;;  %v2445_v47 = vadd.f32 %v2937_v34, %v2536_v42  ;;  %v2166_v48 = vpop.f32.mrb[37].mxu0  ;;  %v2422_v49 = vpop.f32.mrb[25].mxu1 }
0x2a1f   :  { %v2167_v38 = vadd.f32 %v3653_v27, %v2166_v48  ;;  %v2444_v50 = vadd.f32 %v2536_v42, %v2422_v49 }
0x2a20   :  { %2182 = vst.msk [vmem:[%s3820_s13 + $0x38] sm:$0xff] %vm63_vm0, %v2172_v46 }
0x2a21   :  { %2454 = vst.msk [vmem:[%s3825_s14 + $0x38] sm:$0xff] %vm2446_vm4, %v2445_v47  ;;  %2453 = vst.msk [vmem:[%s3825_s14 + $0x30] sm:$0xff] %vm2446_vm4, %v2444_v50 }
0x2a22   :  { %2181 = vst.msk [vmem:[%s3820_s13 + $0x30] sm:$0xff] %vm63_vm0, %v2167_v38 }

</bundles_post_ra>
